<compile_context>
chip_gen: v5e
topology: v5e:2x2
jax: 0.10.0
libtpu: 0.0.40
codegen_flags: <defaults>
</compile_context>

<pallas_src>
import functools
import math

import jax
import jax.numpy as jnp
import numpy as np
from jax.experimental import pallas as pl
from jax.experimental.pallas import tpu as pltpu

_F32_MAX = float(np.finfo(np.float32).max)
_LN_EPS = 1e-5


# ----------------------------- shared math -----------------------------
def _layernorm(x, g, b):
    mu = jnp.mean(x, axis=-1, keepdims=True)
    var = jnp.mean((x - mu) ** 2, axis=-1, keepdims=True)
    return (x - mu) * jax.lax.rsqrt(var + _LN_EPS) * g + b


def _erf_approx(x):
    # Abramowitz & Stegun 7.1.26 (~1.5e-7 abs err); divide routed to the EUP.
    a1, a2, a3, a4, a5 = (0.254829592, -0.284496736, 1.421413741,
                          -1.453152027, 1.061405429)
    p = 0.3275911
    s = jnp.where(x < 0.0, -1.0, 1.0)
    ax = x * s
    t = pl.reciprocal(1.0 + p * ax, approx=True)
    y = 1.0 - ((((a5 * t + a4) * t + a3) * t + a2) * t + a1) * t * jnp.exp(-ax * ax)
    return s * y


def _gelu_kernel(x):
    # torch.nn.GELU default (erf-based); kernel-side approximation, f32.
    return 0.5 * x * (1.0 + _erf_approx(x * (1.0 / math.sqrt(2.0))))


def _mm(a, w_bf16):
    # bf16 x bf16 -> f32 accumulation (MXU native); weights pre-cast host-side.
    return jnp.dot(a.astype(jnp.bfloat16), w_bf16,
                   preferred_element_type=jnp.float32)


# ----------------------------- fused kernel -----------------------------
def _make_mat_kernel(*, depth, heads, dim_head, La, bblk, n, dim_in, model_dim):
    inner = heads * dim_head
    rows = bblk * n
    bf16 = jnp.bfloat16

    def kernel(x_ref, amask_ref, bias_ref,
               ew_ref, eb_ref,
               ag_ref, ab_ref, wqkv_ref, wout_ref, bo_ref,
               fg_ref, fb_ref, w1_ref, b1_ref, w2_ref, b2_ref,
               out_ref, x_acc):
        l = pl.program_id(1)

        # ---- embed_to_model: once per batch block (first depth step) ----
        @pl.when(l == 0)
        def _():
            xe = _mm(x_ref[...].reshape(rows, dim_in), ew_ref[...]) + eb_ref[...]
            x_acc[...] = xe

        x = x_acc[...]                                   # (rows, D) f32, VMEM resident

        # ---- Residual(PreNorm(Attention)) ----
        xn = _layernorm(x, ag_ref[...], ab_ref[...])
        qkv = _mm(xn, wqkv_ref[...])                     # (rows, 3*inner); cols (qkv, h, d)

        def to_heads(slab):                              # (rows, H*dh) -> (bblk*H, n, dh)
            parts = [slab[:, h * dim_head:(h + 1) * dim_head].reshape(bblk, n, dim_head)
                     for h in range(heads)]
            return jnp.stack(parts, axis=1).reshape(bblk * heads, n, dim_head)

        qh = to_heads(qkv[:, :inner])                    # scale folded into wq host-side
        kh = to_heads(qkv[:, inner:2 * inner])
        vh = to_heads(qkv[:, 2 * inner:])

        # scores: single batched matmul over g = bblk*heads
        dots = jnp.einsum('gid,gjd->gij', qh.astype(bf16), kh.astype(bf16),
                          preferred_element_type=jnp.float32)       # (g, n, n)
        dots = dots.reshape(bblk, heads, n, n) + amask_ref[...][:, None]  # additive mask
        m = jnp.max(dots, axis=-1, keepdims=True)
        e = jnp.exp(dots - m)
        inv = pl.reciprocal(jnp.sum(e, axis=-1, keepdims=True), approx=True) * La
        attn = e * inv + bias_ref[...][:, None]          # softmax*La + precomputed bias

        av = jnp.einsum('gij,gjd->gid',
                        attn.reshape(bblk * heads, n, n).astype(bf16),
                        vh.astype(bf16),
                        preferred_element_type=jnp.float32)          # (g, n, dh)

        # fused output projection: (rows, inner) x (inner, D)
        av = av.reshape(bblk, heads, n, dim_head)
        av_rows = jnp.concatenate(
            [av[:, h].reshape(rows, dim_head) for h in range(heads)], axis=-1)
        x = x + _mm(av_rows, wout_ref[...]) + bo_ref[...]

        # ---- Residual(PreNorm(FeedForward)) ----
        xn2 = _layernorm(x, fg_ref[...], fb_ref[...])
        h1 = _gelu_kernel(_mm(xn2, w1_ref[...]) + b1_ref[...])
        x = x + _mm(h1, w2_ref[...]) + b2_ref[...]
        x_acc[...] = x

        # ---- emit final activations (last depth step); LN/pool/head run in XLA ----
        @pl.when(l == depth - 1)
        def _():
            out_ref[...] = x.reshape(bblk, n, model_dim)

    return kernel


# ----------------------------- parameters -----------------------------
def init_mat_params(key, *, dim_in, model_dim, dim_out, depth, heads,
                    dim_head=64, mult=4):
    inner = heads * dim_head
    keys = iter(jax.random.split(key, 64))

    def w(shape, scale=0.05):
        return (scale * jax.random.normal(next(keys), shape)).astype(jnp.float32)

    params = {
        'embed_w': w((dim_in, model_dim)),
        'embed_b': w((1, model_dim)),
        'layers': [],
        'norm_out_g': jnp.ones((1, model_dim), jnp.float32),
        'norm_out_b': jnp.zeros((1, model_dim), jnp.float32),
        'ff_out_w1': w((model_dim, model_dim * mult)),
        'ff_out_b1': w((1, model_dim * mult)),
        'ff_out_w2': w((model_dim * mult, dim_out)),
        'ff_out_b2': w((1, dim_out)),
    }
    for _ in range(depth):
        params['layers'].append({
            'attn_ln_g': jnp.ones((1, model_dim), jnp.float32),
            'attn_ln_b': jnp.zeros((1, model_dim), jnp.float32),
            'wqkv': w((model_dim, inner * 3)),            # torch column order (h, qkv, d)
            'wout': w((inner, model_dim)),
            'bout': w((1, model_dim)),
            'ff_ln_g': jnp.ones((1, model_dim), jnp.float32),
            'ff_ln_b': jnp.zeros((1, model_dim), jnp.float32),
            'ff_w1': w((model_dim, model_dim * mult)),
            'ff_b1': w((1, model_dim * mult)),
            'ff_w2': w((model_dim * mult, model_dim)),
            'ff_b2': w((1, model_dim)),
        })
    return params


def _pick_bblk(batch, n, target_rows=256):
    best = 1
    for d in range(1, batch + 1):
        if batch % d == 0 and d * n <= max(target_rows, n):
            best = d
    return best


# ----------------------------- forward (Pallas) -----------------------------
def mat_forward(params, x, mask=None, adjacency_mat=None, distance_mat=None, *,
                heads, dim_head=64, La=1.0, Ld=0.33, Lg=0.33):
    f32 = jnp.float32
    bf16 = jnp.bfloat16
    B, N, dim_in = x.shape
    model_dim = params['embed_w'].shape[1]
    depth = len(params['layers'])
    inner = heads * dim_head
    scale = dim_head ** -0.5

    x = x.astype(f32)

    # ---- pairwise tensors: additive mask (0 / -F32_MAX) + precomputed bias ----
    if mask is None:
        valid = jnp.ones((B, N, N), bool)
    else:
        m = mask.astype(f32)
        valid = (m[:, :, None] * m[:, None, :]) > 0.5
    add_mask = jnp.where(valid, 0.0, -_F32_MAX).astype(f32)
    adj = (jnp.zeros((B, N, N), f32) if adjacency_mat is None
           else adjacency_mat.astype(f32))
    dist = (jnp.full((B, N, N), _F32_MAX, f32) if distance_mat is None
            else distance_mat.astype(f32))
    pair_bias = (Lg * jnp.where(valid, adj, 0.0)
                 + Ld * jnp.exp(-jnp.where(valid, dist, _F32_MAX)))

    # ---- stack per-layer weights, permute qkv cols, fold scale, cast to bf16 ----
    def stack(name, dtype=f32):
        return jnp.stack([lp[name] for lp in params['layers']], axis=0).astype(dtype)

    # wqkv columns: torch (h, qkv, d) -> (qkv, h, d), fold scale into q columns.
    wqkv_s = jnp.stack(
        [jnp.transpose(lp['wqkv'].reshape(model_dim, heads, 3, dim_head),
                       (0, 2, 1, 3)).reshape(model_dim, 3 * inner)
         for lp in params['layers']], axis=0)
    wqkv_s = wqkv_s.at[:, :, :inner].multiply(scale).astype(bf16)
    wout_s = stack('wout', bf16)                          # rows already (h, d) order
    w1_s = stack('ff_w1', bf16)
    w2_s = stack('ff_w2', bf16)
    embed_w = params['embed_w'].astype(bf16)

    args = (x, add_mask, pair_bias,
            embed_w, params['embed_b'],
            stack('attn_ln_g'), stack('attn_ln_b'), wqkv_s, wout_s, stack('bout'),
            stack('ff_ln_g'), stack('ff_ln_b'),
            w1_s, stack('ff_b1'), w2_s, stack('ff_b2'))

    # ---- grid / BlockSpecs ----
    bblk = _pick_bblk(B, N)
    nb = B // bblk

    def batch_spec(shape):                  # (B, ...) -> (bblk, ...) block
        nz = len(shape) - 1
        return pl.BlockSpec((bblk,) + shape[1:],
                            lambda b, l, _nz=nz: (b,) + (0,) * _nz)

    def layer_spec(shape):                  # (depth, ...) -> per-layer block (depth squeezed)
        nz = len(shape) - 1
        return pl.BlockSpec((None,) + shape[1:],
                            lambda b, l, _nz=nz: (l,) + (0,) * _nz)

    def const_spec(shape):                  # resident across the whole grid
        nd = len(shape)
        return pl.BlockSpec(shape, lambda b, l, _nd=nd: (0,) * _nd)

    in_specs = [batch_spec(args[0].shape),   # x
                batch_spec(args[1].shape),   # add_mask
                batch_spec(args[2].shape),   # pair_bias
                const_spec(args[3].shape),   # embed_w
                const_spec(args[4].shape)]   # embed_b
    in_specs += [layer_spec(a.shape) for a in args[5:]]

    out_specs = pl.BlockSpec((bblk, N, model_dim), lambda b, l: (b, 0, 0))

    kernel = _make_mat_kernel(depth=depth, heads=heads, dim_head=dim_head,
                              La=La, bblk=bblk, n=N, dim_in=dim_in,
                              model_dim=model_dim)

    # TODO(synk): for real configs set vmem_limit_bytes per generation
    # (~96 MiB on v5e/v6e, <=~48-56 MiB on v7x) and tile the FF hidden dim.
    act = pl.pallas_call(
        kernel,
        out_shape=jax.ShapeDtypeStruct((B, N, model_dim), f32),
        grid=(nb, depth),
        in_specs=in_specs,
        out_specs=out_specs,
        scratch_shapes=[pltpu.VMEM((bblk * N, model_dim), f32)],   # resident activation
        compiler_params=pltpu.CompilerParams(
            dimension_semantics=("parallel", "arbitrary")),
    )(*args)

    # ---- epilogue in plain XLA (keeps head weights out of kernel VMEM) ----
    xf = _layernorm(act, params['norm_out_g'], params['norm_out_b'])
    pooled = jnp.mean(xf, axis=-2)                                  # (B, D)
    h = jax.nn.gelu(pooled @ params['ff_out_w1'] + params['ff_out_b1'],
                    approximate=False)
    return h @ params['ff_out_w2'] + params['ff_out_b2']


# ----------------------------- pure-JAX reference -----------------------------
def mat_reference(params, x, mask, adjacency_mat, distance_mat, *,
                  heads, dim_head=64, La=1.0, Ld=0.33, Lg=0.33):
    f32 = jnp.float32
    B, N, _ = x.shape
    m = jnp.ones((B, N), f32) if mask is None else mask.astype(f32)
    mask4 = (m[:, :, None] * m[:, None, :])[:, None] > 0.5
    adj = (jnp.zeros((B, N, N), f32) if adjacency_mat is None
           else adjacency_mat.astype(f32))[:, None]
    dist = (jnp.full((B, N, N), _F32_MAX, f32) if distance_mat is None
            else distance_mat.astype(f32))[:, None]
    adj = jnp.where(mask4, adj, 0.0)
    dist = jnp.where(mask4, dist, _F32_MAX)
    scale = dim_head ** -0.5
    gelu = lambda t: jax.nn.gelu(t, approximate=False)

    x = x.astype(f32) @ params['embed_w'] + params['embed_b']
    for lp in params['layers']:
        xn = _layernorm(x, lp['attn_ln_g'], lp['attn_ln_b'])
        qkv = (xn @ lp['wqkv']).reshape(B, N, heads, 3, dim_head)
        qkv = jnp.transpose(qkv, (0, 2, 1, 3, 4))            # b h n qkv d
        q, k, v = qkv[..., 0, :], qkv[..., 1, :], qkv[..., 2, :]
        dots = jnp.einsum('bhid,bhjd->bhij', q, k) * scale
        dots = jnp.where(mask4, dots, -_F32_MAX)
        attn = jax.nn.softmax(dots, axis=-1) * La + Lg * adj + Ld * jnp.exp(-dist)
        out = jnp.einsum('bhij,bhjd->bhid', attn, v)
        out = jnp.transpose(out, (0, 2, 1, 3)).reshape(B, N, heads * dim_head)
        x = x + out @ lp['wout'] + lp['bout']
        xn = _layernorm(x, lp['ff_ln_g'], lp['ff_ln_b'])
        x = x + gelu(xn @ lp['ff_w1'] + lp['ff_b1']) @ lp['ff_w2'] + lp['ff_b2']
    xn = _layernorm(x, params['norm_out_g'], params['norm_out_b'])
    pooled = jnp.mean(xn, axis=-2)
    return (gelu(pooled @ params['ff_out_w1'] + params['ff_out_b1'])
            @ params['ff_out_w2'] + params['ff_out_b2'])


# ----------------------------- main -----------------------------
if __name__ == "__main__":
    B, N = 2, 8
    dim_in, model_dim, dim_out = 16, 32, 4
    depth, heads, dim_head = 2, 2, 64            # Attention default dim_head=64

    key = jax.random.PRNGKey(0)
    kp, kx, ka, kd = jax.random.split(key, 4)

    params = init_mat_params(kp, dim_in=dim_in, model_dim=model_dim,
                             dim_out=dim_out, depth=depth, heads=heads,
                             dim_head=dim_head)

    x = jax.random.normal(kx, (B, N, dim_in), jnp.float32)
    mask = jnp.ones((B, N), dtype=bool).at[1, -2:].set(False)
    adjacency = jax.random.bernoulli(ka, 0.5, (B, N, N)).astype(jnp.float32)
    distance = jax.random.uniform(kd, (B, N, N), jnp.float32, 0.0, 3.0)

    fwd = jax.jit(functools.partial(mat_forward, heads=heads, dim_head=dim_head,
                                    La=1.0, Ld=0.33, Lg=0.33))
    out = jax.block_until_ready(fwd(params, x, mask, adjacency, distance))

    ref = jax.block_until_ready(
        mat_reference(params, x, mask, adjacency, distance,
                      heads=heads, dim_head=dim_head, La=1.0, Ld=0.33, Lg=0.33))

    assert out.shape == (B, dim_out)
    # kernel does bf16 MXU matmuls with f32 accumulation plus EUP-approx
    # reciprocals; reference is f32 JAX, so allow bf16-level drift.
    np.testing.assert_allclose(np.asarray(out), np.asarray(ref),
                               rtol=5e-2, atol=5e-3)
    print("KERNEL_OK")
</pallas_src>

<mosaic_0001>
module attributes {stable_mosaic.version = 11 : i64} {
  func.func @kernel(%arg0: i32, %arg1: i32, %arg2: memref<2x8x16xf32, #tpu.memory_space<vmem>>, %arg3: memref<2x8x8xf32, #tpu.memory_space<vmem>>, %arg4: memref<2x8x8xf32, #tpu.memory_space<vmem>>, %arg5: memref<16x32xbf16, #tpu.memory_space<vmem>>, %arg6: memref<1x32xf32, #tpu.memory_space<vmem>>, %arg7: memref<1x1x32xf32, #tpu.memory_space<vmem>>, %arg8: memref<1x1x32xf32, #tpu.memory_space<vmem>>, %arg9: memref<1x32x384xbf16, #tpu.memory_space<vmem>>, %arg10: memref<1x128x32xbf16, #tpu.memory_space<vmem>>, %arg11: memref<1x1x32xf32, #tpu.memory_space<vmem>>, %arg12: memref<1x1x32xf32, #tpu.memory_space<vmem>>, %arg13: memref<1x1x32xf32, #tpu.memory_space<vmem>>, %arg14: memref<1x32x128xbf16, #tpu.memory_space<vmem>>, %arg15: memref<1x1x128xf32, #tpu.memory_space<vmem>>, %arg16: memref<1x128x32xbf16, #tpu.memory_space<vmem>>, %arg17: memref<1x1x32xf32, #tpu.memory_space<vmem>>, %arg18: memref<2x8x32xf32, #tpu.memory_space<vmem>>, %arg19: memref<16x32xf32, #tpu.memory_space<vmem>>) attributes {dimension_semantics = [#tpu.dimension_semantics<parallel>, #tpu.dimension_semantics<arbitrary>], iteration_bounds = array<i64: 1, 2>, scalar_prefetch = 0 : i64, scratch_operands = 1 : i64, tpu.core_type = #tpu.core_type<tc>, window_params = [{transform_indices = @transform_0, window_bounds = array<i64: 2, 8, 16>}, {transform_indices = @transform_1, window_bounds = array<i64: 2, 8, 8>}, {transform_indices = @transform_2, window_bounds = array<i64: 2, 8, 8>}, {pipeline_mode = #tpu.pipeline_mode<synchronous>, transform_indices = @transform_3, window_bounds = array<i64: 16, 32>}, {pipeline_mode = #tpu.pipeline_mode<synchronous>, transform_indices = @transform_4, window_bounds = array<i64: 1, 32>}, {transform_indices = @transform_5, window_bounds = array<i64: 1, 1, 32>}, {transform_indices = @transform_6, window_bounds = array<i64: 1, 1, 32>}, {transform_indices = @transform_7, window_bounds = array<i64: 1, 32, 384>}, {transform_indices = @transform_8, window_bounds = array<i64: 1, 128, 32>}, {transform_indices = @transform_9, window_bounds = array<i64: 1, 1, 32>}, {transform_indices = @transform_10, window_bounds = array<i64: 1, 1, 32>}, {transform_indices = @transform_11, window_bounds = array<i64: 1, 1, 32>}, {transform_indices = @transform_12, window_bounds = array<i64: 1, 32, 128>}, {transform_indices = @transform_13, window_bounds = array<i64: 1, 1, 128>}, {transform_indices = @transform_14, window_bounds = array<i64: 1, 128, 32>}, {transform_indices = @transform_15, window_bounds = array<i64: 1, 1, 32>}, {transform_indices = @transform_16, window_bounds = array<i64: 2, 8, 32>}]} {
    %c0_i32 = arith.constant 0 : i32
    %0 = arith.cmpi eq, %arg1, %c0_i32 : i32
    %1 = arith.extui %0 : i1 to i32
    %c0_i32_0 = arith.constant 0 : i32
    %2 = arith.cmpi ne, %1, %c0_i32_0 : i32
    scf.if %2 {
      %c0_77 = arith.constant 0 : index
      %c0_78 = arith.constant 0 : index
      %c0_79 = arith.constant 0 : index
      %193 = vector.load %arg2[%c0_77, %c0_78, %c0_79] : memref<2x8x16xf32, #tpu.memory_space<vmem>>, vector<2x8x16xf32>
      %194 = vector.shape_cast %193 : vector<2x8x16xf32> to vector<16x16xf32>
      %c0_80 = arith.constant 0 : index
      %c0_81 = arith.constant 0 : index
      %195 = vector.load %arg5[%c0_80, %c0_81] : memref<16x32xbf16, #tpu.memory_space<vmem>>, vector<16x32xbf16>
      %196 = arith.truncf %194 : vector<16x16xf32> to vector<16x16xbf16>
      %cst_82 = arith.constant dense<0.000000e+00> : vector<16x32xf32>
      %197 = tpu.matmul %196, %195, %cst_82 {dimension_numbers = #tpu.dot_dimension_numbers<[1], [0], [0], [1], [0, 0, 1, 1], [], []>} : vector<16x16xbf16>, vector<16x32xbf16>, vector<16x32xf32> -> vector<16x32xf32>
      %c0_83 = arith.constant 0 : index
      %c0_84 = arith.constant 0 : index
      %198 = vector.load %arg6[%c0_83, %c0_84] : memref<1x32xf32, #tpu.memory_space<vmem>>, vector<1x32xf32>
      %199 = vector.broadcast %198 : vector<1x32xf32> to vector<16x32xf32>
      %200 = arith.addf %197, %199 : vector<16x32xf32>
      %c0_85 = arith.constant 0 : index
      %c0_86 = arith.constant 0 : index
      %201 = vector.load %arg19[%c0_85, %c0_86] : memref<16x32xf32, #tpu.memory_space<vmem>>, vector<16x32xf32>
      tpu.vector_store %arg19[%c0_85, %c0_86], %200 {strides = array<i32>} : memref<16x32xf32, #tpu.memory_space<vmem>>, vector<16x32xf32>,
    } else {
    }
    %c0 = arith.constant 0 : index
    %c0_1 = arith.constant 0 : index
    %3 = vector.load %arg19[%c0, %c0_1] : memref<16x32xf32, #tpu.memory_space<vmem>>, vector<16x32xf32>
    %c0_2 = arith.constant 0 : index
    %c0_3 = arith.constant 0 : index
    %c0_4 = arith.constant 0 : index
    %4 = vector.load %arg7[%c0_2, %c0_3, %c0_4] : memref<1x1x32xf32, #tpu.memory_space<vmem>>, vector<1x1x32xf32>
    %5 = vector.shape_cast %4 : vector<1x1x32xf32> to vector<1x32xf32>
    %c0_5 = arith.constant 0 : index
    %c0_6 = arith.constant 0 : index
    %c0_7 = arith.constant 0 : index
    %6 = vector.load %arg8[%c0_5, %c0_6, %c0_7] : memref<1x1x32xf32, #tpu.memory_space<vmem>>, vector<1x1x32xf32>
    %7 = vector.shape_cast %6 : vector<1x1x32xf32> to vector<1x32xf32>
    %cst = arith.constant dense<0.000000e+00> : vector<16xf32>
    %8 = vector.multi_reduction <add>, %3, %cst [1] : vector<16x32xf32> to vector<16xf32>
    %9 = vector.shape_cast %8 : vector<16xf32> to vector<16x1xf32>
    %cst_8 = arith.constant 3.200000e+01 : f32
    %10 = vector.broadcast %cst_8 : f32 to vector<16x1xf32>
    %11 = arith.divf %9, %10 : vector<16x1xf32>
    %12 = vector.broadcast %11 : vector<16x1xf32> to vector<16x32xf32>
    %13 = arith.subf %3, %12 : vector<16x32xf32>
    %14 = arith.mulf %13, %13 : vector<16x32xf32>
    %cst_9 = arith.constant dense<0.000000e+00> : vector<16xf32>
    %15 = vector.multi_reduction <add>, %14, %cst_9 [1] : vector<16x32xf32> to vector<16xf32>
    %16 = vector.shape_cast %15 : vector<16xf32> to vector<16x1xf32>
    %cst_10 = arith.constant 3.200000e+01 : f32
    %17 = vector.broadcast %cst_10 : f32 to vector<16x1xf32>
    %18 = arith.divf %16, %17 : vector<16x1xf32>
    %19 = vector.broadcast %11 : vector<16x1xf32> to vector<16x32xf32>
    %20 = arith.subf %3, %19 : vector<16x32xf32>
    %cst_11 = arith.constant 9.99999974E-6 : f32
    %21 = vector.broadcast %cst_11 : f32 to vector<16x1xf32>
    %22 = arith.addf %18, %21 : vector<16x1xf32>
    %23 = math.rsqrt %22 : vector<16x1xf32>
    %24 = vector.broadcast %23 : vector<16x1xf32> to vector<16x32xf32>
    %25 = arith.mulf %20, %24 : vector<16x32xf32>
    %26 = vector.broadcast %5 : vector<1x32xf32> to vector<16x32xf32>
    %27 = arith.mulf %25, %26 : vector<16x32xf32>
    %28 = vector.broadcast %7 : vector<1x32xf32> to vector<16x32xf32>
    %29 = arith.addf %27, %28 : vector<16x32xf32>
    %c0_12 = arith.constant 0 : index
    %c0_13 = arith.constant 0 : index
    %c0_14 = arith.constant 0 : index
    %30 = vector.load %arg9[%c0_12, %c0_13, %c0_14] : memref<1x32x384xbf16, #tpu.memory_space<vmem>>, vector<1x32x384xbf16>
    %31 = vector.shape_cast %30 : vector<1x32x384xbf16> to vector<32x384xbf16>
    %32 = arith.truncf %29 : vector<16x32xf32> to vector<16x32xbf16>
    %cst_15 = arith.constant dense<0.000000e+00> : vector<16x384xf32>
    %33 = tpu.matmul %32, %31, %cst_15 {dimension_numbers = #tpu.dot_dimension_numbers<[1], [0], [0], [1], [0, 0, 1, 1], [], []>} : vector<16x32xbf16>, vector<32x384xbf16>, vector<16x384xf32> -> vector<16x384xf32>
    %34 = vector.extract_strided_slice %33 {offsets = [0, 0], sizes = [16, 128], strides = [1, 1]} : vector<16x384xf32> to vector<16x128xf32>
    %35 = vector.extract_strided_slice %34 {offsets = [0, 0], sizes = [16, 64], strides = [1, 1]} : vector<16x128xf32> to vector<16x64xf32>
    %36 = vector.shape_cast %35 : vector<16x64xf32> to vector<2x8x64xf32>
    %37 = vector.extract_strided_slice %34 {offsets = [0, 64], sizes = [16, 64], strides = [1, 1]} : vector<16x128xf32> to vector<16x64xf32>
    %38 = vector.shape_cast %37 : vector<16x64xf32> to vector<2x8x64xf32>
    %39 = vector.shape_cast %36 : vector<2x8x64xf32> to vector<2x1x8x64xf32>
    %40 = vector.shape_cast %38 : vector<2x8x64xf32> to vector<2x1x8x64xf32>
    %41 = tpu.concatenate %39, %40 in 1 : vector<2x1x8x64xf32>, vector<2x1x8x64xf32> -> vector<2x2x8x64xf32>
    %42 = vector.shape_cast %41 : vector<2x2x8x64xf32> to vector<4x8x64xf32>
    %43 = vector.extract_strided_slice %33 {offsets = [0, 128], sizes = [16, 128], strides = [1, 1]} : vector<16x384xf32> to vector<16x128xf32>
    %44 = vector.extract_strided_slice %43 {offsets = [0, 0], sizes = [16, 64], strides = [1, 1]} : vector<16x128xf32> to vector<16x64xf32>
    %45 = vector.shape_cast %44 : vector<16x64xf32> to vector<2x8x64xf32>
    %46 = vector.extract_strided_slice %43 {offsets = [0, 64], sizes = [16, 64], strides = [1, 1]} : vector<16x128xf32> to vector<16x64xf32>
    %47 = vector.shape_cast %46 : vector<16x64xf32> to vector<2x8x64xf32>
    %48 = vector.shape_cast %45 : vector<2x8x64xf32> to vector<2x1x8x64xf32>
    %49 = vector.shape_cast %47 : vector<2x8x64xf32> to vector<2x1x8x64xf32>
    %50 = tpu.concatenate %48, %49 in 1 : vector<2x1x8x64xf32>, vector<2x1x8x64xf32> -> vector<2x2x8x64xf32>
    %51 = vector.shape_cast %50 : vector<2x2x8x64xf32> to vector<4x8x64xf32>
    %52 = vector.extract_strided_slice %33 {offsets = [0, 256], sizes = [16, 128], strides = [1, 1]} : vector<16x384xf32> to vector<16x128xf32>
    %53 = vector.extract_strided_slice %52 {offsets = [0, 0], sizes = [16, 64], strides = [1, 1]} : vector<16x128xf32> to vector<16x64xf32>
    %54 = vector.shape_cast %53 : vector<16x64xf32> to vector<2x8x64xf32>
    %55 = vector.extract_strided_slice %52 {offsets = [0, 64], sizes = [16, 64], strides = [1, 1]} : vector<16x128xf32> to vector<16x64xf32>
    %56 = vector.shape_cast %55 : vector<16x64xf32> to vector<2x8x64xf32>
    %57 = vector.shape_cast %54 : vector<2x8x64xf32> to vector<2x1x8x64xf32>
    %58 = vector.shape_cast %56 : vector<2x8x64xf32> to vector<2x1x8x64xf32>
    %59 = tpu.concatenate %57, %58 in 1 : vector<2x1x8x64xf32>, vector<2x1x8x64xf32> -> vector<2x2x8x64xf32>
    %60 = vector.shape_cast %59 : vector<2x2x8x64xf32> to vector<4x8x64xf32>
    %61 = arith.truncf %42 : vector<4x8x64xf32> to vector<4x8x64xbf16>
    %62 = arith.truncf %51 : vector<4x8x64xf32> to vector<4x8x64xbf16>
    "tpu.trace_start"() <{level = 10 : i32, message = "gid,gjd->gij"}> : () -> ()
    %cst_16 = arith.constant dense<0.000000e+00> : vector<4x8x8xf32>
    %63 = tpu.matmul %61, %62, %cst_16 {dimension_numbers = #tpu.dot_dimension_numbers<[2], [2], [1], [1], [0, 0, 0, 1, 1, 1], [0], [0]>} : vector<4x8x64xbf16>, vector<4x8x64xbf16>, vector<4x8x8xf32> -> vector<4x8x8xf32>
    "tpu.trace_stop"() : () -> ()
    %64 = vector.shape_cast %63 : vector<4x8x8xf32> to vector<2x2x8x8xf32>
    %c0_17 = arith.constant 0 : index
    %c0_18 = arith.constant 0 : index
    %c0_19 = arith.constant 0 : index
    %65 = vector.load %arg3[%c0_17, %c0_18, %c0_19] : memref<2x8x8xf32, #tpu.memory_space<vmem>>, vector<2x8x8xf32>
    %66 = vector.shape_cast %65 : vector<2x8x8xf32> to vector<2x1x8x8xf32>
    %67 = vector.broadcast %66 : vector<2x1x8x8xf32> to vector<2x2x8x8xf32>
    %68 = arith.addf %64, %67 : vector<2x2x8x8xf32>
    %cst_20 = arith.constant dense<0xFF800000> : vector<2x2x8xf32>
    %69 = vector.multi_reduction <maximumf>, %68, %cst_20 [3] : vector<2x2x8x8xf32> to vector<2x2x8xf32>
    %70 = vector.shape_cast %69 : vector<2x2x8xf32> to vector<2x2x8x1xf32>
    %71 = vector.broadcast %70 : vector<2x2x8x1xf32> to vector<2x2x8x8xf32>
    %72 = arith.subf %68, %71 : vector<2x2x8x8xf32>
    %73 = math.exp %72 : vector<2x2x8x8xf32>
    %cst_21 = arith.constant dense<0.000000e+00> : vector<2x2x8xf32>
    %74 = vector.multi_reduction <add>, %73, %cst_21 [3] : vector<2x2x8x8xf32> to vector<2x2x8xf32>
    %75 = vector.shape_cast %74 : vector<2x2x8xf32> to vector<2x2x8x1xf32>
    %76 = tpu.reciprocal %75 {approx = true} : vector<2x2x8x1xf32> -> vector<2x2x8x1xf32>
    %cst_22 = arith.constant 1.000000e+00 : f32
    %77 = vector.broadcast %cst_22 : f32 to vector<2x2x8x1xf32>
    %78 = arith.mulf %76, %77 : vector<2x2x8x1xf32>
    %79 = vector.broadcast %78 : vector<2x2x8x1xf32> to vector<2x2x8x8xf32>
    %80 = arith.mulf %73, %79 : vector<2x2x8x8xf32>
    %c0_23 = arith.constant 0 : index
    %c0_24 = arith.constant 0 : index
    %c0_25 = arith.constant 0 : index
    %81 = vector.load %arg4[%c0_23, %c0_24, %c0_25] : memref<2x8x8xf32, #tpu.memory_space<vmem>>, vector<2x8x8xf32>
    %82 = vector.shape_cast %81 : vector<2x8x8xf32> to vector<2x1x8x8xf32>
    %83 = vector.broadcast %82 : vector<2x1x8x8xf32> to vector<2x2x8x8xf32>
    %84 = arith.addf %80, %83 : vector<2x2x8x8xf32>
    %85 = vector.shape_cast %84 : vector<2x2x8x8xf32> to vector<4x8x8xf32>
    %86 = arith.truncf %85 : vector<4x8x8xf32> to vector<4x8x8xbf16>
    %87 = arith.truncf %60 : vector<4x8x64xf32> to vector<4x8x64xbf16>
    "tpu.trace_start"() <{level = 10 : i32, message = "gij,gjd->gid"}> : () -> ()
    %cst_26 = arith.constant dense<0.000000e+00> : vector<4x8x64xf32>
    %88 = tpu.matmul %86, %87, %cst_26 {dimension_numbers = #tpu.dot_dimension_numbers<[2], [1], [1], [2], [0, 0, 0, 1, 1, 2], [0], [0]>} : vector<4x8x8xbf16>, vector<4x8x64xbf16>, vector<4x8x64xf32> -> vector<4x8x64xf32>
    "tpu.trace_stop"() : () -> ()
    %89 = vector.shape_cast %88 : vector<4x8x64xf32> to vector<2x2x8x64xf32>
    %90 = vector.extract_strided_slice %89 {offsets = [0, 0, 0, 0], sizes = [2, 1, 8, 64], strides = [1, 1, 1, 1]} : vector<2x2x8x64xf32> to vector<2x1x8x64xf32>
    %91 = vector.shape_cast %90 : vector<2x1x8x64xf32> to vector<2x8x64xf32>
    %92 = vector.shape_cast %91 : vector<2x8x64xf32> to vector<16x64xf32>
    %93 = vector.extract_strided_slice %89 {offsets = [0, 1, 0, 0], sizes = [2, 1, 8, 64], strides = [1, 1, 1, 1]} : vector<2x2x8x64xf32> to vector<2x1x8x64xf32>
    %94 = vector.shape_cast %93 : vector<2x1x8x64xf32> to vector<2x8x64xf32>
    %95 = vector.shape_cast %94 : vector<2x8x64xf32> to vector<16x64xf32>
    %96 = tpu.concatenate %92, %95 in 1 : vector<16x64xf32>, vector<16x64xf32> -> vector<16x128xf32>
    %c0_27 = arith.constant 0 : index
    %c0_28 = arith.constant 0 : index
    %c0_29 = arith.constant 0 : index
    %97 = vector.load %arg10[%c0_27, %c0_28, %c0_29] : memref<1x128x32xbf16, #tpu.memory_space<vmem>>, vector<1x128x32xbf16>
    %98 = vector.shape_cast %97 : vector<1x128x32xbf16> to vector<128x32xbf16>
    %99 = arith.truncf %96 : vector<16x128xf32> to vector<16x128xbf16>
    %cst_30 = arith.constant dense<0.000000e+00> : vector<16x32xf32>
    %100 = tpu.matmul %99, %98, %cst_30 {dimension_numbers = #tpu.dot_dimension_numbers<[1], [0], [0], [1], [0, 0, 1, 1], [], []>} : vector<16x128xbf16>, vector<128x32xbf16>, vector<16x32xf32> -> vector<16x32xf32>
    %101 = arith.addf %3, %100 : vector<16x32xf32>
    %c0_31 = arith.constant 0 : index
    %c0_32 = arith.constant 0 : index
    %c0_33 = arith.constant 0 : index
    %102 = vector.load %arg11[%c0_31, %c0_32, %c0_33] : memref<1x1x32xf32, #tpu.memory_space<vmem>>, vector<1x1x32xf32>
    %103 = vector.shape_cast %102 : vector<1x1x32xf32> to vector<1x32xf32>
    %104 = vector.broadcast %103 : vector<1x32xf32> to vector<16x32xf32>
    %105 = arith.addf %101, %104 : vector<16x32xf32>
    %c0_34 = arith.constant 0 : index
    %c0_35 = arith.constant 0 : index
    %c0_36 = arith.constant 0 : index
    %106 = vector.load %arg12[%c0_34, %c0_35, %c0_36] : memref<1x1x32xf32, #tpu.memory_space<vmem>>, vector<1x1x32xf32>
    %107 = vector.shape_cast %106 : vector<1x1x32xf32> to vector<1x32xf32>
    %c0_37 = arith.constant 0 : index
    %c0_38 = arith.constant 0 : index
    %c0_39 = arith.constant 0 : index
    %108 = vector.load %arg13[%c0_37, %c0_38, %c0_39] : memref<1x1x32xf32, #tpu.memory_space<vmem>>, vector<1x1x32xf32>
    %109 = vector.shape_cast %108 : vector<1x1x32xf32> to vector<1x32xf32>
    %cst_40 = arith.constant dense<0.000000e+00> : vector<16xf32>
    %110 = vector.multi_reduction <add>, %105, %cst_40 [1] : vector<16x32xf32> to vector<16xf32>
    %111 = vector.shape_cast %110 : vector<16xf32> to vector<16x1xf32>
    %cst_41 = arith.constant 3.200000e+01 : f32
    %112 = vector.broadcast %cst_41 : f32 to vector<16x1xf32>
    %113 = arith.divf %111, %112 : vector<16x1xf32>
    %114 = vector.broadcast %113 : vector<16x1xf32> to vector<16x32xf32>
    %115 = arith.subf %105, %114 : vector<16x32xf32>
    %116 = arith.mulf %115, %115 : vector<16x32xf32>
    %cst_42 = arith.constant dense<0.000000e+00> : vector<16xf32>
    %117 = vector.multi_reduction <add>, %116, %cst_42 [1] : vector<16x32xf32> to vector<16xf32>
    %118 = vector.shape_cast %117 : vector<16xf32> to vector<16x1xf32>
    %cst_43 = arith.constant 3.200000e+01 : f32
    %119 = vector.broadcast %cst_43 : f32 to vector<16x1xf32>
    %120 = arith.divf %118, %119 : vector<16x1xf32>
    %121 = vector.broadcast %113 : vector<16x1xf32> to vector<16x32xf32>
    %122 = arith.subf %105, %121 : vector<16x32xf32>
    %cst_44 = arith.constant 9.99999974E-6 : f32
    %123 = vector.broadcast %cst_44 : f32 to vector<16x1xf32>
    %124 = arith.addf %120, %123 : vector<16x1xf32>
    %125 = math.rsqrt %124 : vector<16x1xf32>
    %126 = vector.broadcast %125 : vector<16x1xf32> to vector<16x32xf32>
    %127 = arith.mulf %122, %126 : vector<16x32xf32>
    %128 = vector.broadcast %107 : vector<1x32xf32> to vector<16x32xf32>
    %129 = arith.mulf %127, %128 : vector<16x32xf32>
    %130 = vector.broadcast %109 : vector<1x32xf32> to vector<16x32xf32>
    %131 = arith.addf %129, %130 : vector<16x32xf32>
    %c0_45 = arith.constant 0 : index
    %c0_46 = arith.constant 0 : index
    %c0_47 = arith.constant 0 : index
    %132 = vector.load %arg14[%c0_45, %c0_46, %c0_47] : memref<1x32x128xbf16, #tpu.memory_space<vmem>>, vector<1x32x128xbf16>
    %133 = vector.shape_cast %132 : vector<1x32x128xbf16> to vector<32x128xbf16>
    %134 = arith.truncf %131 : vector<16x32xf32> to vector<16x32xbf16>
    %cst_48 = arith.constant dense<0.000000e+00> : vector<16x128xf32>
    %135 = tpu.matmul %134, %133, %cst_48 {dimension_numbers = #tpu.dot_dimension_numbers<[1], [0], [0], [1], [0, 0, 1, 1], [], []>} : vector<16x32xbf16>, vector<32x128xbf16>, vector<16x128xf32> -> vector<16x128xf32>
    %c0_49 = arith.constant 0 : index
    %c0_50 = arith.constant 0 : index
    %c0_51 = arith.constant 0 : index
    %136 = vector.load %arg15[%c0_49, %c0_50, %c0_51] : memref<1x1x128xf32, #tpu.memory_space<vmem>>, vector<1x1x128xf32>
    %137 = vector.shape_cast %136 : vector<1x1x128xf32> to vector<1x128xf32>
    %138 = vector.broadcast %137 : vector<1x128xf32> to vector<16x128xf32>
    %139 = arith.addf %135, %138 : vector<16x128xf32>
    %cst_52 = arith.constant 5.000000e-01 : f32
    %140 = vector.broadcast %cst_52 : f32 to vector<16x128xf32>
    %141 = arith.mulf %140, %139 : vector<16x128xf32>
    %cst_53 = arith.constant 0.707106769 : f32
    %142 = vector.broadcast %cst_53 : f32 to vector<16x128xf32>
    %143 = arith.mulf %139, %142 : vector<16x128xf32>
    %cst_54 = arith.constant 0.000000e+00 : f32
    %144 = vector.broadcast %cst_54 : f32 to vector<16x128xf32>
    %145 = arith.cmpf olt, %143, %144 : vector<16x128xf32>
    %cst_55 = arith.constant -1.000000e+00 : f32
    %cst_56 = arith.constant 1.000000e+00 : f32
    %146 = vector.broadcast %cst_55 : f32 to vector<16x128xf32>
    %147 = vector.broadcast %cst_56 : f32 to vector<16x128xf32>
    %148 = arith.select %145, %146, %147 : vector<16x128xi1>, vector<16x128xf32>
    %149 = arith.mulf %143, %148 : vector<16x128xf32>
    %cst_57 = arith.constant 0.327591091 : f32
    %150 = vector.broadcast %cst_57 : f32 to vector<16x128xf32>
    %151 = arith.mulf %150, %149 : vector<16x128xf32>
    %cst_58 = arith.constant 1.000000e+00 : f32
    %152 = vector.broadcast %cst_58 : f32 to vector<16x128xf32>
    %153 = arith.addf %152, %151 : vector<16x128xf32>
    %154 = tpu.reciprocal %153 {approx = true} : vector<16x128xf32> -> vector<16x128xf32>
    %cst_59 = arith.constant 1.06140542 : f32
    %155 = vector.broadcast %cst_59 : f32 to vector<16x128xf32>
    %156 = arith.mulf %155, %154 : vector<16x128xf32>
    %cst_60 = arith.constant -1.45315206 : f32
    %157 = vector.broadcast %cst_60 : f32 to vector<16x128xf32>
    %158 = arith.addf %156, %157 : vector<16x128xf32>
    %159 = arith.mulf %158, %154 : vector<16x128xf32>
    %cst_61 = arith.constant 1.42141378 : f32
    %160 = vector.broadcast %cst_61 : f32 to vector<16x128xf32>
    %161 = arith.addf %159, %160 : vector<16x128xf32>
    %162 = arith.mulf %161, %154 : vector<16x128xf32>
    %cst_62 = arith.constant -0.284496725 : f32
    %163 = vector.broadcast %cst_62 : f32 to vector<16x128xf32>
    %164 = arith.addf %162, %163 : vector<16x128xf32>
    %165 = arith.mulf %164, %154 : vector<16x128xf32>
    %cst_63 = arith.constant 0.254829586 : f32
    %166 = vector.broadcast %cst_63 : f32 to vector<16x128xf32>
    %167 = arith.addf %165, %166 : vector<16x128xf32>
    %168 = arith.mulf %167, %154 : vector<16x128xf32>
    %cst_64 = arith.constant 0.000000e+00 : f32
    %169 = vector.broadcast %cst_64 : f32 to vector<16x128xf32>
    %170 = arith.subf %169, %149 : vector<16x128xf32>
    %171 = arith.mulf %170, %149 : vector<16x128xf32>
    %172 = math.exp %171 : vector<16x128xf32>
    %173 = arith.mulf %168, %172 : vector<16x128xf32>
    %cst_65 = arith.constant 1.000000e+00 : f32
    %174 = vector.broadcast %cst_65 : f32 to vector<16x128xf32>
    %175 = arith.subf %174, %173 : vector<16x128xf32>
    %176 = arith.mulf %148, %175 : vector<16x128xf32>
    %cst_66 = arith.constant 1.000000e+00 : f32
    %177 = vector.broadcast %cst_66 : f32 to vector<16x128xf32>
    %178 = arith.addf %177, %176 : vector<16x128xf32>
    %179 = arith.mulf %141, %178 : vector<16x128xf32>
    %c0_67 = arith.constant 0 : index
    %c0_68 = arith.constant 0 : index
    %c0_69 = arith.constant 0 : index
    %180 = vector.load %arg16[%c0_67, %c0_68, %c0_69] : memref<1x128x32xbf16, #tpu.memory_space<vmem>>, vector<1x128x32xbf16>
    %181 = vector.shape_cast %180 : vector<1x128x32xbf16> to vector<128x32xbf16>
    %182 = arith.truncf %179 : vector<16x128xf32> to vector<16x128xbf16>
    %cst_70 = arith.constant dense<0.000000e+00> : vector<16x32xf32>
    %183 = tpu.matmul %182, %181, %cst_70 {dimension_numbers = #tpu.dot_dimension_numbers<[1], [0], [0], [1], [0, 0, 1, 1], [], []>} : vector<16x128xbf16>, vector<128x32xbf16>, vector<16x32xf32> -> vector<16x32xf32>
    %184 = arith.addf %105, %183 : vector<16x32xf32>
    %c0_71 = arith.constant 0 : index
    %c0_72 = arith.constant 0 : index
    %c0_73 = arith.constant 0 : index
    %185 = vector.load %arg17[%c0_71, %c0_72, %c0_73] : memref<1x1x32xf32, #tpu.memory_space<vmem>>, vector<1x1x32xf32>
    %186 = vector.shape_cast %185 : vector<1x1x32xf32> to vector<1x32xf32>
    %187 = vector.broadcast %186 : vector<1x32xf32> to vector<16x32xf32>
    %188 = arith.addf %184, %187 : vector<16x32xf32>
    %c0_74 = arith.constant 0 : index
    %c0_75 = arith.constant 0 : index
    %189 = vector.load %arg19[%c0_74, %c0_75] : memref<16x32xf32, #tpu.memory_space<vmem>>, vector<16x32xf32>
    tpu.vector_store %arg19[%c0_74, %c0_75], %188 {strides = array<i32>} : memref<16x32xf32, #tpu.memory_space<vmem>>, vector<16x32xf32>,
    %c1_i32 = arith.constant 1 : i32
    %190 = arith.cmpi eq, %arg1, %c1_i32 : i32
    %191 = arith.extui %190 : i1 to i32
    %c0_i32_76 = arith.constant 0 : i32
    %192 = arith.cmpi ne, %191, %c0_i32_76 : i32
    scf.if %192 {
      %193 = vector.shape_cast %188 : vector<16x32xf32> to vector<2x8x32xf32>
      %c0_77 = arith.constant 0 : index
      %c0_78 = arith.constant 0 : index
      %c0_79 = arith.constant 0 : index
      %194 = vector.load %arg18[%c0_77, %c0_78, %c0_79] : memref<2x8x32xf32, #tpu.memory_space<vmem>>, vector<2x8x32xf32>
      tpu.vector_store %arg18[%c0_77, %c0_78, %c0_79], %193 {strides = array<i32>} : memref<2x8x32xf32, #tpu.memory_space<vmem>>, vector<2x8x32xf32>,
    } else {
    }
    return
  }
  func.func @transform_0(%arg0: i32, %arg1: i32) -> (i32, i32, i32) {
    %c0_i32 = arith.constant 0 : i32
    %c0_i32_0 = arith.constant 0 : i32
    %c0_i32_1 = arith.constant 0 : i32
    return %arg0, %c0_i32, %c0_i32_0 : i32, i32, i32
  }
  func.func @transform_1(%arg0: i32, %arg1: i32) -> (i32, i32, i32) {
    %c0_i32 = arith.constant 0 : i32
    %c0_i32_0 = arith.constant 0 : i32
    %c0_i32_1 = arith.constant 0 : i32
    return %arg0, %c0_i32, %c0_i32_0 : i32, i32, i32
  }
  func.func @transform_2(%arg0: i32, %arg1: i32) -> (i32, i32, i32) {
    %c0_i32 = arith.constant 0 : i32
    %c0_i32_0 = arith.constant 0 : i32
    %c0_i32_1 = arith.constant 0 : i32
    return %arg0, %c0_i32, %c0_i32_0 : i32, i32, i32
  }
  func.func @transform_3(%arg0: i32, %arg1: i32) -> (i32, i32) {
    %c0_i32 = arith.constant 0 : i32
    %c0_i32_0 = arith.constant 0 : i32
    %c0_i32_1 = arith.constant 0 : i32
    return %c0_i32, %c0_i32_0 : i32, i32
  }
  func.func @transform_4(%arg0: i32, %arg1: i32) -> (i32, i32) {
    %c0_i32 = arith.constant 0 : i32
    %c0_i32_0 = arith.constant 0 : i32
    %c0_i32_1 = arith.constant 0 : i32
    return %c0_i32, %c0_i32_0 : i32, i32
  }
  func.func @transform_5(%arg0: i32, %arg1: i32) -> (i32, i32, i32) {
    %c0_i32 = arith.constant 0 : i32
    %c0_i32_0 = arith.constant 0 : i32
    %c0_i32_1 = arith.constant 0 : i32
    return %arg1, %c0_i32, %c0_i32_0 : i32, i32, i32
  }
  func.func @transform_6(%arg0: i32, %arg1: i32) -> (i32, i32, i32) {
    %c0_i32 = arith.constant 0 : i32
    %c0_i32_0 = arith.constant 0 : i32
    %c0_i32_1 = arith.constant 0 : i32
    return %arg1, %c0_i32, %c0_i32_0 : i32, i32, i32
  }
  func.func @transform_7(%arg0: i32, %arg1: i32) -> (i32, i32, i32) {
    %c0_i32 = arith.constant 0 : i32
    %c0_i32_0 = arith.constant 0 : i32
    %c0_i32_1 = arith.constant 0 : i32
    return %arg1, %c0_i32, %c0_i32_0 : i32, i32, i32
  }
  func.func @transform_8(%arg0: i32, %arg1: i32) -> (i32, i32, i32) {
    %c0_i32 = arith.constant 0 : i32
    %c0_i32_0 = arith.constant 0 : i32
    %c0_i32_1 = arith.constant 0 : i32
    return %arg1, %c0_i32, %c0_i32_0 : i32, i32, i32
  }
  func.func @transform_9(%arg0: i32, %arg1: i32) -> (i32, i32, i32) {
    %c0_i32 = arith.constant 0 : i32
    %c0_i32_0 = arith.constant 0 : i32
    %c0_i32_1 = arith.constant 0 : i32
    return %arg1, %c0_i32, %c0_i32_0 : i32, i32, i32
  }
  func.func @transform_10(%arg0: i32, %arg1: i32) -> (i32, i32, i32) {
    %c0_i32 = arith.constant 0 : i32
    %c0_i32_0 = arith.constant 0 : i32
    %c0_i32_1 = arith.constant 0 : i32
    return %arg1, %c0_i32, %c0_i32_0 : i32, i32, i32
  }
  func.func @transform_11(%arg0: i32, %arg1: i32) -> (i32, i32, i32) {
    %c0_i32 = arith.constant 0 : i32
    %c0_i32_0 = arith.constant 0 : i32
    %c0_i32_1 = arith.constant 0 : i32
    return %arg1, %c0_i32, %c0_i32_0 : i32, i32, i32
  }
  func.func @transform_12(%arg0: i32, %arg1: i32) -> (i32, i32, i32) {
    %c0_i32 = arith.constant 0 : i32
    %c0_i32_0 = arith.constant 0 : i32
    %c0_i32_1 = arith.constant 0 : i32
    return %arg1, %c0_i32, %c0_i32_0 : i32, i32, i32
  }
  func.func @transform_13(%arg0: i32, %arg1: i32) -> (i32, i32, i32) {
    %c0_i32 = arith.constant 0 : i32
    %c0_i32_0 = arith.constant 0 : i32
    %c0_i32_1 = arith.constant 0 : i32
    return %arg1, %c0_i32, %c0_i32_0 : i32, i32, i32
  }
  func.func @transform_14(%arg0: i32, %arg1: i32) -> (i32, i32, i32) {
    %c0_i32 = arith.constant 0 : i32
    %c0_i32_0 = arith.constant 0 : i32
    %c0_i32_1 = arith.constant 0 : i32
    return %arg1, %c0_i32, %c0_i32_0 : i32, i32, i32
  }
  func.func @transform_15(%arg0: i32, %arg1: i32) -> (i32, i32, i32) {
    %c0_i32 = arith.constant 0 : i32
    %c0_i32_0 = arith.constant 0 : i32
    %c0_i32_1 = arith.constant 0 : i32
    return %arg1, %c0_i32, %c0_i32_0 : i32, i32, i32
  }
  func.func @transform_16(%arg0: i32, %arg1: i32) -> (i32, i32, i32) {
    %c0_i32 = arith.constant 0 : i32
    %c0_i32_0 = arith.constant 0 : i32
    %c0_i32_1 = arith.constant 0 : i32
    return %arg0, %c0_i32, %c0_i32_0 : i32, i32, i32
  }
}

</mosaic_0001>

<bundles_post_ra>
// kernel: mat_forward.1
= control target key start
LH: loop header
LB: loop body
LE: loop exit
PB: predicated region body
PF: predicated region fallthrough
CT: control target
= control target key end

     0   :  { %s2095_s21 = smov 0   ;;  %s2097_s22 = smov 0   ;;  %s2364_s0 = inlined_call_operand.vmem [shape: f32[2,8,16], index: 0, kind: input, shape index: {}]   ;;  %s2365_s1 = inlined_call_operand.vmem [shape: f32[2,8,8], index: 1, kind: input, shape index: {}]   ;;  %s2366_s2 = inlined_call_operand.vmem [shape: f32[2,8,8], index: 2, kind: input, shape index: {}]   ;;  %s2367_s3 = inlined_call_operand.vmem [shape: bf16[16,32], index: 3, kind: input, shape index: {}]   ;;  %s2368_s4 = inlined_call_operand.vmem [shape: f32[1,32], index: 4, kind: input, shape index: {}]   ;;  %s2369_s5 = inlined_call_operand.vmem [shape: f32[2,1,32], index: 5, kind: input, shape index: {}]   ;;  %s2370_s6 = inlined_call_operand.vmem [shape: f32[2,1,32], index: 6, kind: input, shape index: {}]   ;;  %s2371_s7 = inlined_call_operand.vmem [shape: bf16[2,32,384], index: 7, kind: input, shape index: {}]   ;;  %s2372_s8 = inlined_call_operand.vmem [shape: bf16[2,128,32], index: 8, kind: input, shape index: {}]   ;;  %s2373_s9 = inlined_call_operand.vmem [shape: f32[2,1,32], index: 9, kind: input, shape index: {}]   ;;  %s2374_s10 = inlined_call_operand.vmem [shape: f32[2,1,32], index: 10, kind: input, shape index: {}]   ;;  %s2375_s11 = inlined_call_operand.vmem [shape: f32[2,1,32], index: 11, kind: input, shape index: {}]   ;;  %s2376_s12 = inlined_call_operand.vmem [shape: bf16[2,32,128], index: 12, kind: input, shape index: {}]   ;;  %s2377_s13 = inlined_call_operand.vmem [shape: f32[2,1,128], index: 13, kind: input, shape index: {}]   ;;  %s2378_s14 = inlined_call_operand.vmem [shape: bf16[2,128,32], index: 14, kind: input, shape index: {}]   ;;  %s2379_s15 = inlined_call_operand.vmem [shape: f32[2,1,32], index: 15, kind: input, shape index: {}]   ;;  %s2380_s16 = inlined_call_operand.vmem [shape: f32[2,8,32], index: 16, kind: output, shape index: {}]  }
   0x1   :  { %2388 = sst [smem:[#allocation7_spill]] %s2364_s0  ;;  %s2099_s23 = smov 0  }
   0x2   :  { %2389 = sst [smem:[#allocation8_spill]] %s2365_s1 }
   0x3   :  { %2390 = sst [smem:[#allocation9_spill]] %s2366_s2 }
   0x4   :  { %2391 = sst [smem:[#allocation10_spill]] %s2370_s6 }
   0x5   :  { %2392 = sst [smem:[#allocation11_spill]] %s2372_s8 }
   0x6   :  { %2393 = sst [smem:[#allocation12_spill]] %s2380_s16 }
   0x7 LB: > { %2394 = sst [smem:[#allocation3_spill]] %s2001_s22  ;;  %s35_s24 = sadd.s32 1, %s2001_s22  ;;  %s2005_s23 = sphi %s2099_s23, %s26_s23   ;;  %s2001_s22 = sphi %s2097_s22, %s2412_s22   ;;  %s1997_s21 = sphi %s2095_s21, %s2411_s21  }
   0x8   : > { %2395 = sst [smem:[#allocation4_spill]] %s2005_s23  ;;  %p1753_p0 = scmp.ge.s32.totalorder %s2005_s23, 1 }
   0x9   : > { %p36_p1 = scmp.ge.s32.totalorder %s35_s24, 2  ;;  %p593_p2 = scmp.lt.s32.totalorder %s2005_s23, 3 }
   0xb   : > { %s2414_s24 = smov (%p36_p1, %s35_s24), 0  ;;  %p594_p3 = pnand %p1753_p0, %p593_p2 }
   0xc   : > { %2396 = sst [smem:[#allocation5_spill]] %s2414_s24 }
   0xd   : > { %597 = sbr.rel (%p594_p3) target bundleno = 2095 (0x82f), region = 84 }
  0x12   : > { %p712_p4 = scmp.lt.s32.totalorder %s1997_s21, 1  ;;  %s2398_s8 = sld [smem:[#allocation11_spill]] }
  0x13   : > { %p1761_p5 = scmp.ne.s32.totalorder %s1997_s21, 0 }
  0x14   : > { %s2117_s25 = scalar_select %p712_p4, %s1997_s21, 1 }
  0x15   : > { %s2400_s24 = sld [smem:[#allocation7_spill]] (!%p1761_p5) }
  0x16   : > { %s1908_s17 = smul.u32 48, %s2117_s25  ;;  %s1880_s18 = sshll.u32 %s2117_s25, 6 }
  0x17   : > { %s733_s29 = scalar_lea.vmem %s2374_s10, %s2117_s25  ;;  %s736_s6 = scalar_lea.vmem %s2375_s11, %s2117_s25 }
  0x18   : > { %s2132_s26 = scalar_lea.vmem %s2398_s8, %s1880_s18  ;;  %s2141_s2 = scalar_lea.vmem %s2371_s7, %s1908_s17 }
  0x19   : > { %2399 = sst [smem:[#allocation6_spill]] %s2132_s26  ;;  %s1881_s19 = sshll.u32 %s2117_s25, 4 }
  0x1a   : > { %s2155_s26 = scalar_lea.vmem %s2376_s12, %s1881_s19  ;;  %s2164_s22 = scalar_lea.vmem %s2378_s14, %s1880_s18 }
  0x1b   : > { %s752_s0 = scalar_lea.vmem %s2379_s15, %s2117_s25  ;;  %763 = sbr.rel (%p1761_p5) target bundleno = 173 (0xad), region = 88 }
  0x20   : > { %v1883_v0 = vld [vmem:[%s2367_s3] sm:$0xff]  ;;  %v765_v2 = vld [vmem:[%s2400_s24 + $0x8] sm:$0xff]  ;;  %vm779_vm0 = vcmask 130048   ;;  %vm797_vm1 = vcmask 261120  }
  0x21   : > { %v764_v1 = vld [vmem:[%s2400_s24] sm:$0xff]  ;;  %790 = vmatpush.bf16.msra.mxu0 %v1883_v0 }
  0x22   : > { %v768_v3 = vpack.c.bf16 %v765_v2, %v764_v1  ;;  %v1936_v4 = vld [vmem:[%s2368_s4] ss:$0 sm:$0xff] }
  0x24   : > { %1766 = vmatmul.msk.bf16.vlgmr.msra.gmra.mxu0 %vm779_vm0, %v768_v3 }
  0xa1   : > { %v792_v5 = vpop.f32.mrf.mxu0 }
  0xa2   : > { %v793_v6 = vadd.f32 %v1936_v4, %v792_v5 }
  0xa4   : > { %798 = vst.msk [vmem:[#allocation2] sm:$0xff] %vm797_vm1, %v793_v6 }
  0xa9   : > { %v794_v7 = vpop.f32.mrf.mxu0 }
  0xaa   : > { %v795_v8 = vadd.f32 %v1936_v4, %v794_v7 }
  0xac   : > { %799 = vst.msk [vmem:[#allocation2 + $0x8] sm:$0xff] %vm797_vm1, %v795_v8 }
  0xad PF: > { %v2183_v9 = vld [vmem:[#allocation2] sm:$0xff]  ;;  %vm804_vm2 = vcmask 261120   ;;  %v2007_v13 = vmov 32.0   ;;  %v1781_v30 = vld [vmem:[%s2141_s2 + $0x18] sm:$0xf]  ;;  %s2401_s17 = scalar_lea.vmem %s2369_s5, %s2117_s25  ;;  %s2402_s30 = sld [smem:[#allocation10_spill]] }
  0xae   : > { %v805_v10 = vsel %vm804_vm2, %v2183_v9, 0.0  ;;  %1949 = vrcp.f32 %v2007_v13  ;;  %v1888_v31 = vld [vmem:[%s2141_s2 + $0x20] sm:$0xf0]  ;;  %v1887_v32 = vld [vmem:[%s2141_s2 + $0x1c] sm:$0xf]  ;;  %s2008_s19 = smov 64   ;;  %s2407_s23 = scalar_lea.vmem %s2373_s9, %s2117_s25 }
  0xaf   : > { %806 = vadd.xlane.f32.xlu0 %v805_v10  ;;  %v1782_v33 = vor.u32 %v1888_v31, %v1781_v30  ;;  %v1783_v34 = vld [vmem:[%s2141_s2 + $0x24] sm:$0xf0]  ;;  %v1769_v36 = vld [vmem:[%s2141_s2] sm:$0xf]  ;;  %v1885_v37 = vld [vmem:[%s2141_s2 + $0x8] sm:$0xf0]  ;;  %s2408_s28 = scalar_lea.vmem %s2377_s13, %s2117_s25 }
  0xb0   : > { %v1786_v35 = vor.u32 %v1887_v32, %v1783_v34  ;;  %v1884_v38 = vld [vmem:[%s2141_s2 + $0x4] sm:$0xf]  ;;  %v1770_v40 = vor.u32 %v1885_v37, %v1769_v36  ;;  %v1771_v41 = vld [vmem:[%s2141_s2 + $0xc] sm:$0xf0]  ;;  %v1789_v45 = vld [vmem:[%s2141_s2 + $0x20] sm:$0xf] }
  0xb1   : > { %916 = vmatpush.bf16.msra.mxu0 %v1782_v33  ;;  %v1774_v43 = vor.u32 %v1884_v38, %v1771_v41  ;;  %v1889_v46 = vld [vmem:[%s2141_s2 + $0x28] sm:$0xf0]  ;;  %v1777_v47 = vld [vmem:[%s2141_s2 + $0x8] sm:$0xf]  ;;  %v1886_v50 = vld [vmem:[%s2141_s2 + $0x10] sm:$0xf0] }
  0xb2   : > { %930 = vmatpush.bf16.msra.mxu2 %v1786_v35  ;;  %v1790_v49 = vor.u32 %v1889_v46, %v1789_v45  ;;  %v1778_v52 = vor.u32 %v1886_v50, %v1777_v47  ;;  %v1942_v3 = vld [vmem:[%s2401_s17] ss:$0 sm:$0xff]  ;;  %vm984_vm10 = vcmask 523264   ;;  %vm1129_vm11 = vcmask 1043456   ;;  %s2404_s18 = sld [smem:[#allocation8_spill]]  ;;  %p1875_p6 = scmp.ne.s32.totalorder %s1997_s21, 1 }
  0xb3   : > { %v2187_v11 = vld [vmem:[#allocation2 + $0x8] sm:$0xff]  ;;  %s2403_s8 = scalar_lea.vmem %s2402_s30, %s2117_s25  ;;  %vm1067_vm12 = vcmask 64512   ;;  %s2405_s1 = sld [smem:[#allocation9_spill]] }
  0xb4   : > { %v808_v12 = vsel %vm804_vm2, %v2187_v11, 0.0  ;;  %v1950_v14 = vpop.eup %1949  ;;  %v1943_v8 = vld [vmem:[%s2403_s8] ss:$0 sm:$0xff]  ;;  %s2406_s8 = sld [smem:[#allocation6_spill]] }
  0xb5   : > { %v812_v15 = vmul.f32 32.0, %v1950_v14  ;;  %vm816_vm3 = vweird.f32 %v1950_v14  ;;  %917 = vmatpush.bf16.msra.mxu0 %v1770_v40  ;;  %s2409_s25 = sld [smem:[#allocation12_spill]] (!%p1875_p6) }
  0xb6   : > { %931 = vmatpush.bf16.msra.mxu2 %v1774_v43 }
  0xb7   : > { %809 = vadd.xlane.f32.xlu0 %v808_v12  ;;  %v813_v16 = vsub.f32 1.0, %v812_v15 }
  0xb9   : > { %v814_v17 = vmul.f32 %v1950_v14, %v813_v16 }
  0xba   : > { %944 = vmatpush.bf16.msrb.mxu2 %v1790_v49  ;;  %v1062_v49 = vld [vmem:[%s2404_s18 + $0x8] sm:$0xff] }
  0xbb   : > { %v815_v18 = vadd.f32 %v1950_v14, %v814_v17 }
  0xbd   : > { %v2191_v19 = vsel %vm816_vm3, %v1950_v14, %v815_v18 }
  0xbe   : > { %945 = vmatpush.bf16.msrb.mxu2 %v1778_v52 }
 0x122   : > { %v807_v20 = vpop.xlane.xlu0 %806 }
 0x123   : > { %v818_v21 = vmul.f32 %v2191_v19, %v807_v20 }
 0x125   : > { %v820_v22 = vsub.f32 %v2183_v9, %v818_v21 }
 0x127   : > { %v822_v23 = vmul.f32 %v820_v22, %v820_v22 }
 0x129   : > { %v824_v24 = vsel %vm804_vm2, %v822_v23, 0.0 }
 0x12a   : > { %825 = vadd.xlane.f32.xlu1 %v824_v24  ;;  %v810_v25 = vpop.xlane.xlu0 %809 }
 0x12b   : > { %v819_v26 = vmul.f32 %v2191_v19, %v810_v25 }
 0x12d   : > { %v821_v27 = vsub.f32 %v2187_v11, %v819_v26 }
 0x12f   : > { %v823_v28 = vmul.f32 %v821_v27, %v821_v27 }
 0x131   : > { %v827_v29 = vsel %vm804_vm2, %v823_v28, 0.0 }
 0x132   : > { %828 = vadd.xlane.f32.xlu1 %v827_v29 }
 0x19d   : > { %v826_v39 = vpop.xlane.xlu1 %825 }
 0x19e   : > { %v830_v42 = vmul.f32 %v826_v39, %v2191_v19 }
 0x1a0   : > { %v832_v44 = vadd.f32 1e-05, %v830_v42  ;;  %v1061_v42 = vld [vmem:[%s2404_s18] sm:$0xff] }
 0x1a2   : > { %1951 = vrsqrt.f32 %v832_v44  ;;  %vm840_vm5 = vweird.f32 %v832_v44 }
 0x1a5   : > { %v829_v48 = vpop.xlane.xlu1 %828 }
 0x1a6   : > { %v831_v51 = vmul.f32 %v829_v48, %v2191_v19 }
 0x1a8   : > { %v1952_v53 = vpop.eup %1951  ;;  %v833_v54 = vadd.f32 1e-05, %v831_v51 }
 0x1a9   : > { %v835_v55 = vmul.f32 %v1952_v53, %v832_v44  ;;  %vm841_vm4 = vweird.f32 %v1952_v53 }
 0x1aa   : > { %1953 = vrsqrt.f32 %v833_v54  ;;  %vm842_vm6 = vmor %vm840_vm5, %vm841_vm4  ;;  %vm850_vm8 = vweird.f32 %v833_v54 }
 0x1ab   : > { %v836_v56 = vmul.f32 %v1952_v53, %v835_v55 }
 0x1ad   : > { %v837_v57 = vmul.f32 0.5, %v836_v56 }
 0x1af   : > { %v838_v58 = vsub.f32 1.5, %v837_v57 }
 0x1b0   : > { %v1954_v59 = vpop.eup %1953 }
 0x1b1   : > { %v839_v60 = vmul.f32 %v1952_v53, %v838_v58  ;;  %v845_v61 = vmul.f32 %v1954_v59, %v833_v54  ;;  %vm851_vm7 = vweird.f32 %v1954_v59 }
 0x1b2   : > { %vm852_vm9 = vmor %vm850_vm8, %vm851_vm7 }
 0x1b3   : > { %v846_v62 = vmul.f32 %v1954_v59, %v845_v61  ;;  %v843_v63 = vsel %vm842_vm6, %v1952_v53, %v839_v60 }
 0x1b4   : > { %v854_v2 = vmul.f32 %v843_v63, %v820_v22 }
 0x1b5   : > { %v847_v0 = vmul.f32 0.5, %v846_v62 }
 0x1b6   : > { %v859_v7 = vmul.f32 %v1942_v3, %v854_v2 }
 0x1b7   : > { %v848_v1 = vsub.f32 1.5, %v847_v0 }
 0x1b8   : > { %v864_v12 = vadd.f32 %v1943_v8, %v859_v7 }
 0x1b9   : > { %v849_v4 = vmul.f32 %v1954_v59, %v848_v1 }
 0x1bb   : > { %v853_v5 = vsel %vm852_vm9, %v1954_v59, %v849_v4 }
 0x1bc   : > { %v855_v6 = vmul.f32 %v853_v5, %v821_v27 }
 0x1be   : > { %v860_v10 = vmul.f32 %v1942_v3, %v855_v6 }
 0x1c0   : > { %v865_v13 = vadd.f32 %v1943_v8, %v860_v10 }
 0x1c2   : > { %v874_v14 = vpack.c.bf16 %v865_v13, %v864_v12 }
 0x1c4   : > { %1791 = vmatmul.msk.bf16.vlgmr.msra.gmra.mxu0 %vm804_vm2, %v874_v14  ;;  %1792 = vmatmul.msk.bf16.vlgmr.msra.gmra.mxu2 %vm804_vm2, %v874_v14 }
 0x1d4   : > { %1793 = vmatmul.msk.bf16.vlgmr.msrb.gmra.mxu2 %vm804_vm2, %v874_v14 }
 0x241   : > { %v919_v15 = vpop.f32.mrf.mxu0 }
 0x242   : > { %954 = vrot.lane.b32.xlu1 %v919_v15, %s2008_s19  ;;  %v976_v21 = vpack.c.bf16 %v919_v15, %v919_v15 }
 0x247   : > { %v933_v16 = vpop.f32.mrf.mxu2 }
 0x248   : > { %962 = vrot.lane.b32.xlu0 %v933_v16, %s2008_s19  ;;  %v980_v17 = vpack.c.bf16 %v933_v16, %v933_v16 }
 0x249   : > { %v921_v24 = vpop.f32.mrf.mxu0 }
 0x24a   : > { %v989_v18 = vsel %vm984_vm10, %v980_v17, 0  ;;  %v978_v26 = vpack.c.bf16 %v921_v24, %v921_v24 }
 0x24b   : > { %998 = vmatpush.bf16.xpose.msra.mxu3 %v989_v18 }
 0x24f   : > { %v935_v20 = vpop.f32.mrf.mxu2 }
 0x250   : > { %964 = vrot.lane.b32.xlu2 %v935_v20, %s2008_s19  ;;  %v982_v22 = vpack.c.bf16 %v935_v20, %v935_v20 }
 0x252   : > { %1794 = vmatmul.msk.bf16.vlgmr.msra.gmra.mxu3 %vm984_vm10, %v976_v21  ;;  %v1027_v23 = vsel %vm984_vm10, %v982_v22, 0 }
 0x253   : > { %1036 = vmatpush.bf16.xpose.msra.mxu1 %v1027_v23 }
 0x257   : > { %v2232_v25 = vpop.f32.mrf.mxu2 }
 0x258   : > { %v1122_v27 = vpack.c.bf16 %v2232_v25, %v2232_v25  ;;  %956 = vrot.lane.b32.xlu2 %v921_v24, %s2008_s19  ;;  %v1112_v24 = vld [vmem:[%s2405_s1] sm:$0xff] }
 0x25a   : > { %1796 = vmatmul.msk.bf16.vlgmr.msra.gmra.mxu1 %vm984_vm10, %v978_v26  ;;  %v1131_v28 = vsel %vm1129_vm11, %v1122_v27, 0 }
 0x25b   : > { %1140 = vmatpush.bf16.msrb.mxu3 %v1131_v28 }
 0x25f   : > { %v949_v29 = vpop.f32.mrf.mxu2 }
 0x260   : > { %v1124_v30 = vpack.c.bf16 %v949_v29, %v949_v29 }
 0x262   : > { %v1169_v31 = vsel %vm1129_vm11, %v1124_v30, 0 }
 0x263   : > { %1178 = vmatpush.bf16.msrb.mxu1 %v1169_v31 }
 0x2aa   : > { %v965_v32 = vpop.permute.xlu2 %964 }
 0x2ab   : > { %v983_v33 = vpack.c.bf16 %v965_v32, %v965_v32  ;;  %v1113_v32 = vld [vmem:[%s2405_s1 + $0x8] sm:$0xff] }
 0x2ad   : > { %v1046_v34 = vsel %vm984_vm10, %v983_v33, 0 }
 0x2ae   : > { %1055 = vmatpush.bf16.xpose.msra.mxu2 %v1046_v34 }
 0x2b2   : > { %v957_v35 = vpop.permute.xlu2 %956 }
 0x2b3   : > { %v979_v36 = vpack.c.bf16 %v957_v35, %v957_v35 }
 0x2b4   : > { %v955_v40 = vpop.permute.xlu1 %954 }
 0x2b5   : > { %1797 = vmatmul.msk.bf16.vlgmr.msra.gmra.mxu2 %vm984_vm10, %v979_v36  ;;  %v977_v41 = vpack.c.bf16 %v955_v40, %v955_v40 }
 0x2ba   : > { %v963_v37 = vpop.permute.xlu0 %962 }
 0x2bb   : > { %v981_v38 = vpack.c.bf16 %v963_v37, %v963_v37 }
 0x2bd   : > { %v1008_v39 = vsel %vm984_vm10, %v981_v38, 0 }
 0x2be   : > { %1017 = vmatpush.bf16.xpose.msrb.mxu0 %v1008_v39 }
 0x2c5   : > { %1795 = vmatmul.msk.bf16.vlgmr.msrb.gmra.mxu0 %vm984_vm10, %v977_v41 }
 0x2d5   : > { %v1000_v43 = vpop.f32.mrf.mxu3 }
 0x2d6   : > { %v1063_v44 = vadd.f32 %v1061_v42, %v1000_v43 }
 0x2d7   : > { %v1038_v45 = vpop.f32.mrf.mxu1 }
 0x2d8   : > { %v1068_v46 = vsel %vm1067_vm12, %v1063_v44, -inf  ;;  %v1065_v53 = vadd.f32 %v1062_v49, %v1038_v45 }
 0x2d9   : > { %1069 = vmax.xlane.f32.xlu1 %v1068_v46 }
 0x2da   : > { %v1074_v57 = vsel %vm1067_vm12, %v1065_v53, -inf }
 0x2dd   : > { %v1002_v47 = vpop.f32.mrf.mxu3 }
 0x2df   : > { %v1040_v48 = vpop.f32.mrf.mxu1 }
 0x338   : > { %v1057_v50 = vpop.f32.mrf.mxu2 }
 0x339   : > { %v1066_v51 = vadd.f32 %v1062_v49, %v1057_v50  ;;  %v1897_v49 = vld [vmem:[%s2406_s8 + $0x38] sm:$0xff]  ;;  %v1896_v50 = vld [vmem:[%s2406_s8 + $0x30] sm:$0xff] }
 0x33a   : > { %1278 = vmatpush.bf16.msra.mxu3 %v1897_v49  ;;  %v1946_v49 = vld [vmem:[%s736_s6] ss:$0 sm:$0xff] }
 0x33b   : > { %v1077_v52 = vsel %vm1067_vm12, %v1066_v51, -inf }
 0x33c   : > { %1078 = vmax.xlane.f32.xlu2 %v1077_v52 }
 0x33e   : > { %1279 = vmatpush.bf16.msra.mxu3 %v1896_v50 }
 0x340   : > { %v1059_v54 = vpop.f32.mrf.mxu2 }
 0x341   : > { %v1893_v54 = vld [vmem:[%s2406_s8 + $0x18] sm:$0xff] }
 0x342   : > { %v1019_v55 = vpop.f32.mrf.mxu0 }
 0x343   : > { %v1064_v56 = vadd.f32 %v1061_v42, %v1019_v55 }
 0x344   : > { %1075 = vmax.xlane.f32.xlu2 %v1074_v57 }
 0x345   : > { %v1071_v58 = vsel %vm1067_vm12, %v1064_v56, -inf }
 0x346   : > { %1072 = vmax.xlane.f32.xlu0 %v1071_v58  ;;  %v1891_v58 = vld [vmem:[%s2406_s8 + $0x8] sm:$0xff] }
 0x34a   : > { %v1021_v59 = vpop.f32.mrf.mxu0 }
 0x34c   : > { %v1070_v60 = vpop.xlane.xlu1 %1069 }
 0x34d   : > { %v1080_v61 = vsub.f32 %v1063_v44, %v1070_v60 }
 0x34f   : > { %v1084_v62 = vmul.f32 1.442695, %v1080_v61 }
 0x351   : > { %1955 = vpow2.f32 %v1084_v62 }
 0x357   : > { %v1956_v63 = vpop.eup %1955 }
 0x358   : > { %v1092_v0 = vsel %vm1067_vm12, %v1956_v63, 0.0 }
 0x359   : > { %1093 = vadd.xlane.f32.xlu1 %v1092_v0 }
 0x35a   : > { %972 = vrot.lane.b32.xlu0 %v949_v29, %s2008_s19 }
 0x3af   : > { %v1079_v1 = vpop.xlane.xlu2 %1078 }
 0x3b0   : > { %v1083_v7 = vsub.f32 %v1066_v51, %v1079_v1  ;;  %v1895_v51 = vld [vmem:[%s2406_s8 + $0x28] sm:$0xff] }
 0x3b1   : > { %1280 = vmatpush.bf16.msra.mxu3 %v1895_v51 }
 0x3b2   : > { %v1090_v10 = vmul.f32 1.442695, %v1083_v7 }
 0x3b7   : > { %v1076_v2 = vpop.xlane.xlu2 %1075 }
 0x3b8   : > { %v1082_v3 = vsub.f32 %v1065_v53, %v1076_v2  ;;  %v1894_v53 = vld [vmem:[%s2406_s8 + $0x20] sm:$0xff] }
 0x3b9   : > { %v1073_v4 = vpop.xlane.xlu0 %1072  ;;  %1281 = vmatpush.bf16.msra.mxu3 %v1894_v53 }
 0x3ba   : > { %v1088_v5 = vmul.f32 1.442695, %v1082_v3  ;;  %v1081_v6 = vsub.f32 %v1064_v56, %v1073_v4  ;;  %v1892_v56 = vld [vmem:[%s2406_s8 + $0x10] sm:$0xff] }
 0x3bc   : > { %1957 = vpow2.f32 %v1088_v5  ;;  %v1086_v8 = vmul.f32 1.442695, %v1081_v6  ;;  %v1944_v6 = vld [vmem:[%s2407_s23] ss:$0 sm:$0xff] }
 0x3bd   : > { %1282 = vmatpush.bf16.msra.mxu3 %v1893_v54 }
 0x3be   : > { %1959 = vpow2.f32 %v1086_v8 }
 0x3bf   : > { %1961 = vpow2.f32 %v1090_v10 }
 0x3c1   : > { %1283 = vmatpush.bf16.msra.mxu3 %v1892_v56  ;;  %v1907_v56 = vld [vmem:[%s2164_s22 + $0x38] sm:$0xff] }
 0x3c2   : > { %v1958_v12 = vpop.eup %1957  ;;  %1511 = vmatpush.bf16.msra.mxu1 %v1907_v56 }
 0x3c3   : > { %v1098_v13 = vsel %vm1067_vm12, %v1958_v12, 0.0 }
 0x3c4   : > { %v1960_v14 = vpop.eup %1959  ;;  %1099 = vadd.xlane.f32.xlu1 %v1098_v13 }
 0x3c5   : > { %v1095_v15 = vsel %vm1067_vm12, %v1960_v14, 0.0  ;;  %v1962_v16 = vpop.eup %1961  ;;  %1284 = vmatpush.bf16.msra.mxu3 %v1891_v58  ;;  %v1906_v58 = vld [vmem:[%s2164_s22 + $0x30] sm:$0xff] }
 0x3c6   : > { %1096 = vadd.xlane.f32.xlu2 %v1095_v15  ;;  %v1101_v21 = vsel %vm1067_vm12, %v1962_v16, 0.0  ;;  %1512 = vmatpush.bf16.msra.mxu1 %v1906_v58 }
 0x3cc   : > { %v1094_v17 = vpop.xlane.xlu1 %1093  ;;  %v973_v18 = vpop.permute.xlu0 %972 }
 0x3cd   : > { %1963 = vrcp.f32 %v1094_v17  ;;  %v1125_v20 = vpack.c.bf16 %v973_v18, %v973_v18 }
 0x3ce   : > { %1102 = vadd.xlane.f32.xlu2 %v1101_v21 }
 0x3cf   : > { %v1188_v22 = vsel %vm1129_vm11, %v1125_v20, 0 }
 0x3d0   : > { %1197 = vmatpush.bf16.msrb.mxu2 %v1188_v22 }
 0x3d3   : > { %v1964_v23 = vpop.eup %1963 }
 0x3d4   : > { %v1108_v26 = vmul.f32 %v1964_v23, %v1956_v63  ;;  %v1890_v63 = vld [vmem:[%s2406_s8] sm:$0xff] }
 0x3d5   : > { %1285 = vmatpush.bf16.msra.mxu3 %v1890_v63  ;;  %v1904_v63 = vld [vmem:[%s2164_s22 + $0x20] sm:$0xff] }
 0x3d6   : > { %v1114_v27 = vadd.f32 %v1112_v24, %v1108_v26 }
 0x3d8   : > { %v1118_v28 = vpack.c.bf16 %v1114_v27, %v1114_v27  ;;  %v1899_v27 = vld [vmem:[%s2155_s26 + $0x8] sm:$0xff] }
 0x3da   : > { %1798 = vmatmul.msk.bf16.vlgmr.msrb.gmra.mxu3 %vm1067_vm12, %v1118_v28 }
 0x3e6   : > { %970 = vrot.lane.b32.xlu2 %v2232_v25, %s2008_s19 }
 0x437   : > { %v1100_v29 = vpop.xlane.xlu1 %1099 }
 0x438   : > { %1965 = vrcp.f32 %v1100_v29 }
 0x439   : > { %v1097_v30 = vpop.xlane.xlu2 %1096 }
 0x43a   : > { %1967 = vrcp.f32 %v1097_v30  ;;  %v1898_v30 = vld [vmem:[%s2155_s26] sm:$0xff] }
 0x43e   : > { %v1966_v31 = vpop.eup %1965 }
 0x43f   : > { %v1110_v33 = vmul.f32 %v1966_v31, %v1958_v12 }
 0x440   : > { %v1968_v36 = vpop.eup %1967 }
 0x441   : > { %v1103_v34 = vpop.xlane.xlu2 %1102  ;;  %v1116_v35 = vadd.f32 %v1113_v32, %v1110_v33  ;;  %v1109_v38 = vmul.f32 %v1968_v36, %v1960_v14 }
 0x442   : > { %1969 = vrcp.f32 %v1103_v34 }
 0x443   : > { %v1120_v37 = vpack.c.bf16 %v1116_v35, %v1116_v35  ;;  %v1115_v41 = vadd.f32 %v1112_v24, %v1109_v38 }
 0x445   : > { %1800 = vmatmul.msk.bf16.vlgmr.msrb.gmra.mxu1 %vm1067_vm12, %v1120_v37  ;;  %v1119_v46 = vpack.c.bf16 %v1115_v41, %v1115_v41 }
 0x448   : > { %v1970_v25 = vpop.eup %1969 }
 0x449   : > { %v1111_v39 = vmul.f32 %v1970_v25, %v1962_v16  ;;  %v971_v40 = vpop.permute.xlu2 %970 }
 0x44a   : > { %v1123_v42 = vpack.c.bf16 %v971_v40, %v971_v40 }
 0x44b   : > { %v1117_v43 = vadd.f32 %v1113_v32, %v1111_v39 }
 0x44c   : > { %v1150_v44 = vsel %vm1129_vm11, %v1123_v42, 0 }
 0x44d   : > { %v1121_v45 = vpack.c.bf16 %v1117_v43, %v1117_v43  ;;  %1159 = vmatpush.bf16.msra.mxu0 %v1150_v44 }
 0x44f   : > { %1801 = vmatmul.msk.bf16.vlgmr.msrb.gmra.mxu2 %vm1067_vm12, %v1121_v45 }
 0x450   : > { %1799 = vmatmul.msk.bf16.vlgmr.msra.gmra.mxu0 %vm1067_vm12, %v1119_v46 }
 0x451   : > { %1386 = vmatpush.bf16.msrb.mxu0 %v1899_v27 }
 0x455   : > { %1387 = vmatpush.bf16.msrb.mxu0 %v1898_v30 }
 0x45d   : > { %v1142_v47 = vpop.f32.mrf.mxu3 }
 0x465   : > { %v1144_v48 = vpop.f32.mrf.mxu3 }
 0x4c2   : > { %v1180_v52 = vpop.f32.mrf.mxu1 }
 0x4ca   : > { %v1182_v55 = vpop.f32.mrf.mxu1 }
 0x4cd   : > { %v1161_v57 = vpop.f32.mrf.mxu0 }
 0x4d2   : > { %v1199_v59 = vpop.f32.mrf.mxu2 }
 0x4d3   : > { %v1937_v60 = vpack.i.bf16 %v1199_v59, %v1161_v57  ;;  %v1947_v57 = vld [vmem:[%s2408_s28] ss:$0 sm:$0xff] }
 0x4d5   : > { %1938 = vrot.lane.b32.xlu0 %v1937_v60, %s2008_s19  ;;  %v1163_v61 = vpop.f32.mrf.mxu0 }
 0x4d6   : > { %v1905_v61 = vld [vmem:[%s2164_s22 + $0x28] sm:$0xff] }
 0x4d7   : > { %1513 = vmatpush.bf16.msra.mxu1 %v1905_v61 }
 0x4da   : > { %v1201_v62 = vpop.f32.mrf.mxu2 }
 0x4db   : > { %1514 = vmatpush.bf16.msra.mxu1 %v1904_v63 }
 0x547   : > { %v1939_v0 = vpop.permute.xlu0 %1938 }
 0x548   : > { %v1941_v1 = vunpack.i.h.bf16 %v1939_v0  ;;  %v1940_v2 = vunpack.i.l.bf16 %v1939_v0  ;;  %v2009_v0 = vmov 1.0  }
 0x54a   : > { %v1211_v3 = vsel %vm984_vm10, %v1142_v47, %v1940_v2  ;;  %v1212_v4 = vsel %vm984_vm10, %v1180_v52, %v1941_v1 }
 0x54b   : > { %v1229_v5 = vpack.c.bf16 %v1212_v4, %v1211_v3 }
 0x54d   : > { %1286 = vmatmul.bf16.vlgmr.msra.gmra.mxu3 %v1229_v5 }
 0x5d0   : > { %v1287_v7 = vpop.f32.mrf.mxu3 }
 0x5d1   : > { %v1292_v8 = vadd.f32 %v1287_v7, %v2183_v9 }
 0x5d3   : > { %v2290_v10 = vadd.f32 %v1944_v6, %v1292_v8 }
 0x5d5   : > { %v1302_v12 = vsel %vm804_vm2, %v2290_v10, 0.0 }
 0x5d6   : > { %1303 = vadd.xlane.f32.xlu1 %v1302_v12  ;;  %v1902_v12 = vld [vmem:[%s2164_s22 + $0x10] sm:$0xff] }
 0x5d8   : > { %v1289_v13 = vpop.f32.mrf.mxu3 }
 0x5d9   : > { %v1293_v14 = vadd.f32 %v1289_v13, %v2187_v11 }
 0x5db   : > { %v2295_v15 = vadd.f32 %v1944_v6, %v1293_v14  ;;  %v1903_v6 = vld [vmem:[%s2164_s22 + $0x18] sm:$0xff] }
 0x5dc   : > { %1515 = vmatpush.bf16.msra.mxu1 %v1903_v6 }
 0x5dd   : > { %v1305_v16 = vsel %vm804_vm2, %v2295_v15, 0.0 }
 0x5de   : > { %1306 = vadd.xlane.f32.xlu2 %v1305_v16 }
 0x5e0   : > { %1516 = vmatpush.bf16.msra.mxu1 %v1902_v12 }
 0x649   : > { %v1304_v17 = vpop.xlane.xlu1 %1303 }
 0x64a   : > { %v1308_v9 = vmul.f32 %v1304_v17, %v2191_v19  ;;  %v1901_v17 = vld [vmem:[%s2164_s22 + $0x8] sm:$0xff] }
 0x64b   : > { %1517 = vmatpush.bf16.msra.mxu1 %v1901_v17 }
 0x64c   : > { %v1310_v18 = vsub.f32 %v2290_v10, %v1308_v9 }
 0x64e   : > { %v1312_v20 = vmul.f32 %v1310_v18, %v1310_v18 }
 0x650   : > { %v1314_v21 = vsel %vm804_vm2, %v1312_v20, 0.0 }
 0x651   : > { %1315 = vadd.xlane.f32.xlu0 %v1314_v21  ;;  %v1307_v22 = vpop.xlane.xlu2 %1306 }
 0x652   : > { %v1309_v11 = vmul.f32 %v1307_v22, %v2191_v19  ;;  %v1900_v22 = vld [vmem:[%s2164_s22] sm:$0xff] }
 0x653   : > { %1518 = vmatpush.bf16.msra.mxu1 %v1900_v22 }
 0x654   : > { %v1311_v23 = vsub.f32 %v2295_v15, %v1309_v11 }
 0x656   : > { %v1313_v24 = vmul.f32 %v1311_v23, %v1311_v23 }
 0x658   : > { %v1317_v26 = vsel %vm804_vm2, %v1313_v24, 0.0 }
 0x659   : > { %1318 = vadd.xlane.f32.xlu1 %v1317_v26 }
 0x6c4   : > { %v1316_v28 = vpop.xlane.xlu0 %1315 }
 0x6c5   : > { %v1320_v29 = vmul.f32 %v1316_v28, %v2191_v19 }
 0x6c7   : > { %v1322_v31 = vadd.f32 1e-05, %v1320_v29 }
 0x6c9   : > { %1971 = vrsqrt.f32 %v1322_v31  ;;  %vm1330_vm14 = vweird.f32 %v1322_v31 }
 0x6cc   : > { %v1319_v32 = vpop.xlane.xlu1 %1318 }
 0x6cd   : > { %v1321_v33 = vmul.f32 %v1319_v32, %v2191_v19  ;;  %v1945_v19 = vld [vmem:[%s733_s29] ss:$0 sm:$0xff] }
 0x6cf   : > { %v1972_v34 = vpop.eup %1971  ;;  %v1323_v35 = vadd.f32 1e-05, %v1321_v33 }
 0x6d0   : > { %v1325_v36 = vmul.f32 %v1972_v34, %v1322_v31  ;;  %vm1331_vm13 = vweird.f32 %v1972_v34 }
 0x6d1   : > { %1973 = vrsqrt.f32 %v1323_v35  ;;  %vm1332_vm15 = vmor %vm1330_vm14, %vm1331_vm13  ;;  %vm1340_vm1 = vweird.f32 %v1323_v35 }
 0x6d2   : > { %v1326_v37 = vmul.f32 %v1972_v34, %v1325_v36 }
 0x6d4   : > { %v1327_v38 = vmul.f32 0.5, %v1326_v37 }
 0x6d6   : > { %v1328_v25 = vsub.f32 1.5, %v1327_v38 }
 0x6d7   : > { %v1974_v39 = vpop.eup %1973 }
 0x6d8   : > { %v1329_v40 = vmul.f32 %v1972_v34, %v1328_v25  ;;  %v1335_v41 = vmul.f32 %v1974_v39, %v1323_v35  ;;  %vm1341_vm0 = vweird.f32 %v1974_v39 }
 0x6d9   : > { %vm1342_vm3 = vmor %vm1340_vm1, %vm1341_vm0 }
 0x6da   : > { %v1336_v42 = vmul.f32 %v1974_v39, %v1335_v41  ;;  %v1333_v43 = vsel %vm1332_vm15, %v1972_v34, %v1329_v40 }
 0x6db   : > { %v1344_v46 = vmul.f32 %v1333_v43, %v1310_v18 }
 0x6dc   : > { %v1337_v44 = vmul.f32 0.5, %v1336_v42 }
 0x6dd   : > { %v1349_v50 = vmul.f32 %v1945_v19, %v1344_v46 }
 0x6de   : > { %v1338_v45 = vsub.f32 1.5, %v1337_v44 }
 0x6df   : > { %v1354_v53 = vadd.f32 %v1946_v49, %v1349_v50 }
 0x6e0   : > { %v1339_v47 = vmul.f32 %v1974_v39, %v1338_v45 }
 0x6e2   : > { %v1343_v48 = vsel %vm1342_vm3, %v1974_v39, %v1339_v47 }
 0x6e3   : > { %v1345_v51 = vmul.f32 %v1343_v48, %v1311_v23 }
 0x6e5   : > { %v1350_v52 = vmul.f32 %v1945_v19, %v1345_v51 }
 0x6e7   : > { %v1355_v54 = vadd.f32 %v1946_v49, %v1350_v52 }
 0x6e9   : > { %v1360_v55 = vpack.c.bf16 %v1355_v54, %v1354_v53 }
 0x6eb   : > { %1842 = vmatmul.msk.bf16.vlgmr.msrb.gmra.mxu0 %vm804_vm2, %v1360_v55 }
 0x768   : > { %v1389_v59 = vpop.f32.mrf.mxu0 }
 0x769   : > { %v2327_v60 = vadd.f32 %v1947_v57, %v1389_v59  ;;  %v1948_v59 = vld [vmem:[%s752_s0] ss:$0 sm:$0xff] }
 0x76b   : > { %v1396_v62 = vmul.f32 0.70710677, %v2327_v60  ;;  %v1394_v53 = vmul.f32 0.5, %v2327_v60 }
 0x76d   : > { %vm1398_vm4 = vcmp.lt.f32.partialorder %v1396_v62, 0.0 }
 0x76e   : > { %v1400_v1 = vsel %vm1398_vm4, -1.0, %v2009_v0 }
 0x76f   : > { %v1402_v2 = vmul.f32 %v1400_v1, %v1396_v62 }
 0x770   : > { %v1391_v3 = vpop.f32.mrf.mxu0 }
 0x771   : > { %v1404_v4 = vmul.f32 0.3275911, %v1402_v2  ;;  %v1392_v5 = vadd.f32 %v1947_v57, %v1391_v3  ;;  %v1428_v18 = vsub.f32 0.0, %v1402_v2 }
 0x773   : > { %v1406_v7 = vadd.f32 1.0, %v1404_v4  ;;  %v1397_v8 = vmul.f32 0.70710677, %v1392_v5  ;;  %v1430_v23 = vmul.f32 %v1428_v18, %v1402_v2  ;;  %v1395_v54 = vmul.f32 0.5, %v1392_v5 }
 0x775   : > { %1975 = vrcp.f32 %v1406_v7  ;;  %vm1399_vm5 = vcmp.lt.f32.partialorder %v1397_v8, 0.0  ;;  %v1432_v28 = vmul.f32 1.442695, %v1430_v23 }
 0x776   : > { %v1401_v13 = vsel %vm1399_vm5, -1.0, %v2009_v0 }
 0x777   : > { %v1403_v14 = vmul.f32 %v1401_v13, %v1397_v8 }
 0x779   : > { %v1405_v16 = vmul.f32 0.3275911, %v1403_v14  ;;  %v1429_v29 = vsub.f32 0.0, %v1403_v14 }
 0x77b   : > { %v1976_v9 = vpop.eup %1975  ;;  %v1407_v20 = vadd.f32 1.0, %v1405_v16  ;;  %v1431_v34 = vmul.f32 %v1429_v29, %v1403_v14 }
 0x77c   : > { %v1410_v21 = vmul.f32 1.0614054, %v1976_v9 }
 0x77d   : > { %1977 = vrcp.f32 %v1407_v20  ;;  %v1434_v25 = vmul.f32 1.442695, %v1431_v34 }
 0x77e   : > { %v1412_v11 = vadd.f32 -1.4531521, %v1410_v21  ;;  %1979 = vpow2.f32 %v1432_v28 }
 0x77f   : > { %1981 = vpow2.f32 %v1434_v25 }
 0x780   : > { %v1414_v24 = vmul.f32 %v1976_v9, %v1412_v11 }
 0x782   : > { %v1416_v26 = vadd.f32 1.4214138, %v1414_v24 }
 0x783   : > { %v1978_v27 = vpop.eup %1977 }
 0x784   : > { %v1418_v30 = vmul.f32 %v1976_v9, %v1416_v26  ;;  %v1411_v31 = vmul.f32 1.0614054, %v1978_v27  ;;  %v1980_v41 = vpop.eup %1979 }
 0x785   : > { %v1982_v47 = vpop.eup %1981 }
 0x786   : > { %v1420_v32 = vadd.f32 -0.28449672, %v1418_v30  ;;  %v1413_v33 = vadd.f32 -1.4531521, %v1411_v31 }
 0x788   : > { %v1422_v35 = vmul.f32 %v1976_v9, %v1420_v32  ;;  %v1415_v36 = vmul.f32 %v1978_v27, %v1413_v33 }
 0x78a   : > { %v1424_v37 = vadd.f32 0.2548296, %v1422_v35  ;;  %v1417_v38 = vadd.f32 1.4214138, %v1415_v36 }
 0x78c   : > { %v1426_v39 = vmul.f32 %v1976_v9, %v1424_v37  ;;  %v1419_v40 = vmul.f32 %v1978_v27, %v1417_v38 }
 0x78e   : > { %v1436_v42 = vmul.f32 %v1980_v41, %v1426_v39  ;;  %v1421_v43 = vadd.f32 -0.28449672, %v1419_v40 }
 0x790   : > { %v1423_v44 = vmul.f32 %v1978_v27, %v1421_v43  ;;  %v1438_v45 = vsub.f32 1.0, %v1436_v42 }
 0x792   : > { %v1425_v19 = vadd.f32 0.2548296, %v1423_v44  ;;  %v1440_v48 = vmul.f32 %v1438_v45, %v1400_v1 }
 0x794   : > { %v1427_v46 = vmul.f32 %v1978_v27, %v1425_v19  ;;  %v1442_v51 = vadd.f32 1.0, %v1440_v48 }
 0x796   : > { %v1437_v49 = vmul.f32 %v1982_v47, %v1427_v46  ;;  %v1444_v56 = vmul.f32 %v1442_v51, %v1394_v53 }
 0x798   : > { %v1439_v50 = vsub.f32 1.0, %v1437_v49 }
 0x79a   : > { %v1441_v52 = vmul.f32 %v1439_v50, %v1401_v13 }
 0x79c   : > { %v1443_v55 = vadd.f32 1.0, %v1441_v52 }
 0x79e   : > { %v1445_v57 = vmul.f32 %v1443_v55, %v1395_v54 }
 0x7a0   : > { %v1462_v58 = vpack.c.bf16 %v1445_v57, %v1444_v56 }
 0x7a2   : > { %1519 = vmatmul.bf16.vlgmr.msra.gmra.mxu1 %v1462_v58 }
 0x81f   : > { %v1520_v61 = vpop.f32.mrf.mxu1 }
 0x820   : > { %v1525_v62 = vadd.f32 %v1520_v61, %v2290_v10 }
 0x822   : > { %v1531_v63 = vadd.f32 %v1948_v59, %v1525_v62 }
 0x824   : > { %1533 = vst.msk [vmem:[#allocation2] sm:$0xff] %vm804_vm2, %v1531_v63 }
 0x827   : > { %v1522_v0 = vpop.f32.mrf.mxu1 }
 0x828   : > { %v1526_v60 = vadd.f32 %v1522_v0, %v2295_v15  ;;  %1538 = sbr.rel (%p1875_p6) target bundleno = 2095 (0x82f), region = 92 }
 0x82a   : > { %v1532_v1 = vadd.f32 %v1948_v59, %v1526_v60 }
 0x82c   : > { %1534 = vst.msk [vmem:[#allocation2 + $0x8] sm:$0xff] %vm804_vm2, %v1532_v1 }
 0x82d   : > { %1539 = vst.msk [vmem:[%s2409_s25] sm:$0xff] %vm804_vm2, %v1531_v63 }
 0x82e   : > { %1540 = vst.msk [vmem:[%s2409_s25 + $0x8] sm:$0xff] %vm804_vm2, %v1532_v1 }
 0x82f PF: > { %s2410_s27 = sld [smem:[#allocation4_spill]] }
 0x830   : > { %s2411_s21 = sld [smem:[#allocation3_spill]] }
 0x831   : > { %s2412_s22 = sld [smem:[#allocation5_spill]] }
 0x835   : > { %s26_s23 = sadd.s32 1, %s2410_s27  }
 0x836   : > { %p23_p7 = scmp.ge.s32.totalorder %s26_s23, 4  }
 0x838   :  { %25 = sbr.rel (!%p23_p7) target bundleno = 7 (0x7), region = 161 }

</bundles_post_ra>
